<compile_context>
chip_gen: v7x
topology: tpu7x:2x2x1
jax: 0.10.0
libtpu: 0.0.40
codegen_flags: <defaults>
</compile_context>

<pallas_src>
import functools

import jax
import jax.numpy as jnp
import numpy as np
from jax.experimental import pallas as pl
from jax.experimental.pallas import tpu as pltpu

BN_EPS = 1e-5

# lax.dot_general dimension numbers: contract axis 0 of both operands
# (lhs given "transposed"); the MXU handles this orientation natively.
_TN_DIMS = (((0,), (0,)), ((), ()))


# ----------------------------------------------------------------------------
# Fused ASM kernel (one batch element per grid step).
# ----------------------------------------------------------------------------
def _asm_kernel(dec_ref, enc_ref, hig_ref, wqkv_ref, bias_ref, ww_ref,
                w1t_ref, w2_ref, out_ref, *, H, W):
    """NonLocalBlock(decoder) + concat([enc, z, hig]) + SELayer, fused.

    Layout (channels on sublanes, N = H*W on lanes):
      dec_ref : (1, C,  N)      enc_ref : (1, Ce, N)      hig_ref : (1, Ch, N)
      wqkv    : (3*Ci, C) bf16  stacked [theta; phi; g] 1x1-conv weights
      bias    : (3*Ci + C, 1)   packed [b_theta; b_phi; b_g; bw_folded]
      ww      : (C, Ci)  bf16   W 1x1-conv weight with BN folded in
      w1t     : (Call, Cr)      SE fc1 weight, pre-transposed
      w2      : (Call, Cr)      SE fc2 weight (PyTorch layout)
      out_ref : (1, Call, N)    SE-scaled [encoder, nonlocal(decoder), higher]
    """
    C = dec_ref.shape[1]
    N = dec_ref.shape[2]
    Ce = enc_ref.shape[1]
    Ch = hig_ref.shape[1]
    Ci3 = wqkv_ref.shape[0]
    Ci = Ci3 // 3

    xT = dec_ref[0]                                    # (C, N) f32
    bias = bias_ref[...]                               # (3Ci + C, 1) f32

    # --- fused theta/phi/g 1x1 convolutions: one MXU pass --------------------
    proj = jnp.dot(wqkv_ref[...], xT.astype(jnp.bfloat16),
                   preferred_element_type=jnp.float32) + bias[0:Ci3, :]
    theta = proj[0:Ci, :]                              # (Ci, N)

    # --- 2x2 max-pool of phi/g, fully lane-dense ------------------------------
    # Column index n = h*W + w.  shift-and-max over (+W) then (+1) puts the
    # pooled value of output cell (h', w') at column n = 2h'*W + 2w'; the other
    # columns hold finite garbage and are masked out of the softmax below.
    pg = proj[Ci:Ci3, :]                               # (2Ci, N)
    pg_s = jnp.concatenate([pg[:, W:], pg[:, :W]], axis=1)    # col n -> n + W
    hm = jnp.maximum(pg, pg_s)
    hm_s = jnp.concatenate([hm[:, 1:], hm[:, :1]], axis=1)    # col n -> n + 1
    pm = jnp.maximum(hm, hm_s)                         # (2Ci, N)
    phi_m = pm[0:Ci, :].astype(jnp.bfloat16)           # (Ci, N)
    g_m = pm[Ci:, :].astype(jnp.bfloat16)              # (Ci, N)

    # --- reassociated W conv: (ww @ g) is independent of the attention -------
    wg = jnp.dot(ww_ref[...], g_m, preferred_element_type=jnp.float32)  # (C, N)

    # --- attention logits over all N key columns (invalid keys masked) -------
    # fT[k, q] = phi_pool[:, k] . theta[:, q]   (keys on sublanes, queries on lanes)
    fT = jax.lax.dot_general(phi_m, theta.astype(jnp.bfloat16), _TN_DIMS,
                             preferred_element_type=jnp.float32)   # (N, N)

    # Valid key columns: even h and even w  <=>  (n mod 2W) < W  and  n even.
    kidx = jax.lax.broadcasted_iota(jnp.int32, (N, 1), 0)
    valid = ((kidx % (2 * W)) < W) & ((kidx % 2) == 0)
    maskf = valid.astype(jnp.float32)                  # (N, 1)

    fmax = jnp.max(fT, axis=0, keepdims=True)          # (1, N) over keys
    e = jnp.exp(fT - fmax) * maskf                     # invalid keys -> exactly 0
    denom = jnp.sum(e, axis=0, keepdims=True)          # (1, N)
    attnT = (e * pl.reciprocal(denom, approx=True)).astype(jnp.bfloat16)

    # --- single post-softmax matmul + folded-BN bias + residual ---------------
    wyT = jnp.dot(wg.astype(jnp.bfloat16), attnT,
                  preferred_element_type=jnp.float32) + bias[Ci3:Ci3 + C, :]
    zT = wyT + xT                                      # (C, N) non-local output

    # --- SE layer over concat([encoder, z, higher]) along channels -----------
    encT = enc_ref[0]                                  # (Ce, N)
    higT = hig_ref[0]                                  # (Ch, N)
    inv_n = 1.0 / N
    m_enc = jnp.sum(encT, axis=1, keepdims=True) * inv_n          # (Ce, 1)
    m_z = jnp.sum(zT, axis=1, keepdims=True) * inv_n              # (C, 1)
    m_hig = jnp.sum(higT, axis=1, keepdims=True) * inv_n          # (Ch, 1)

    # SE FCs on the VPU (an MXU matmul with a 1-column result wastes the array
    # and pays two push/pop round trips at the serial tail of the kernel).
    w1t = w1t_ref[...]                                 # (Call, Cr)
    h = (jnp.sum(w1t[0:Ce, :] * m_enc, axis=0, keepdims=True) +
         jnp.sum(w1t[Ce:Ce + C, :] * m_z, axis=0, keepdims=True) +
         jnp.sum(w1t[Ce + C:, :] * m_hig, axis=0, keepdims=True))  # (1, Cr)
    h = jnp.maximum(h, 0.0)
    s = jax.nn.sigmoid(
        jnp.sum(w2_ref[...] * h, axis=1, keepdims=True))           # (Call, 1)

    # --- store the three SE-scaled slabs directly (no concat temporary) ------
    out_ref[0, 0:Ce, :] = encT * s[0:Ce, :]
    out_ref[0, Ce:Ce + C, :] = zT * s[Ce:Ce + C, :]
    out_ref[0, Ce + C:Ce + C + Ch, :] = higT * s[Ce + C:Ce + C + Ch, :]


# ----------------------------------------------------------------------------
# Wrapper: parameter packing / BN folding + pallas_call.
# ----------------------------------------------------------------------------
def asm_forward(higerencoder, encoder, decoder, params):
    """ASM.forward. All three inputs are NCHW; output is NCHW (B, Call, H, W)."""
    B, C, H, W = decoder.shape
    Ce = encoder.shape[1]
    Ch = higerencoder.shape[1]
    assert H % 2 == 0 and W % 2 == 0, "2x2 max-pool assumes even H and W"
    N = H * W
    Call = Ce + C + Ch
    Ci = params["wth"].shape[0]
    Cr = params["w1"].shape[0]

    # NCHW -> (B, C, N) is a free reshape (no transpose, no extra HBM traffic).
    dec = decoder.reshape(B, C, N).astype(jnp.float32)
    enc = encoder.reshape(B, Ce, N).astype(jnp.float32)
    hig = higerencoder.reshape(B, Ch, N).astype(jnp.float32)

    # Pack / fold parameters once at trace time (tiny arrays):
    #  * stack theta/phi/g conv weights into one QKV matmul weight (bf16),
    #  * fold BatchNorm (inference, running_mean=0, running_var=1) into W,
    #  * pack the per-channel biases into a single column vector,
    #  * pre-transpose the SE fc1 weight so the kernel never transposes.
    # TODO(synk): load real BN running stats / trained gamma-beta for parity
    # with a trained PyTorch ASM (the module zero-inits them -> W_y == 0).
    wqkv = jnp.concatenate([params["wth"], params["wph"], params["wg"]],
                           axis=0).astype(jnp.bfloat16)               # (3Ci, C)
    bn_scale = params["gamma"] / jnp.sqrt(1.0 + BN_EPS)
    ww_f = (params["ww"] * bn_scale[:, None]).astype(jnp.bfloat16)    # (C, Ci)
    bw_f = params["bw"] * bn_scale + params["beta"]                   # (C,)
    bias = jnp.concatenate(
        [params["bth"], params["bph"], params["bg"], bw_f])[:, None]  # (3Ci+C,1)
    w1t = params["w1"].T.astype(jnp.float32)                          # (Call, Cr)
    w2 = params["w2"].astype(jnp.float32)                             # (Call, Cr)

    kernel = functools.partial(_asm_kernel, H=H, W=W)

    def weight_spec(shape):
        return pl.BlockSpec(shape, lambda b: (0,) * len(shape))

    out = pl.pallas_call(
        kernel,
        out_shape=jax.ShapeDtypeStruct((B, Call, N), jnp.float32),
        grid=(B,),
        in_specs=[
            pl.BlockSpec((1, C, N), lambda b: (b, 0, 0)),
            pl.BlockSpec((1, Ce, N), lambda b: (b, 0, 0)),
            pl.BlockSpec((1, Ch, N), lambda b: (b, 0, 0)),
            weight_spec((3 * Ci, C)),
            weight_spec((3 * Ci + C, 1)),
            weight_spec((C, Ci)),
            weight_spec((Call, Cr)),
            weight_spec((Call, Cr)),
        ],
        out_specs=pl.BlockSpec((1, Call, N), lambda b: (b, 0, 0)),
        compiler_params=pltpu.CompilerParams(
            dimension_semantics=("parallel",)),
        # TODO(synk): for large H*W, tile the query columns over a second
        # parallel grid axis (switching the keys back to a compacted Np set)
        # so the (Nk, Nq) logits fit v7x's 64 MiB VMEM and both of its
        # TensorCores stay busy when B == 1.
        # TODO(synk): if batch grows, block several batch elements per grid
        # step and run the 1x1 convs / SE scaling on a merged (C, Bt*N) view.
    )(dec, enc, hig, wqkv, bias, ww_f, w1t, w2)

    return out.reshape(B, Call, H, W)


# ----------------------------------------------------------------------------
# Deterministic synthetic parameter init (PyTorch weight layouts).
# ----------------------------------------------------------------------------
def init_params(key, in_channels, all_channels, reduction=16):
    Ci = max(in_channels // 2, 1)
    Cr = all_channels // reduction
    ks = jax.random.split(key, 12)

    def rn(k, shape, scale):
        return scale * jax.random.normal(k, shape, dtype=jnp.float32)

    # NOTE: the PyTorch module zero-inits BN gamma/beta (making W_y == 0 at
    # init); we use small nonzero values so the full non-local path is
    # exercised numerically.
    return dict(
        wth=rn(ks[0], (Ci, in_channels), 0.1), bth=rn(ks[1], (Ci,), 0.1),
        wph=rn(ks[2], (Ci, in_channels), 0.1), bph=rn(ks[3], (Ci,), 0.1),
        wg=rn(ks[4], (Ci, in_channels), 0.1), bg=rn(ks[5], (Ci,), 0.1),
        ww=rn(ks[6], (in_channels, Ci), 0.1), bw=rn(ks[7], (in_channels,), 0.1),
        gamma=rn(ks[8], (in_channels,), 0.5), beta=rn(ks[9], (in_channels,), 0.1),
        w1=rn(ks[10], (Cr, all_channels), 0.2),   # Linear(Call -> Call//16), no bias
        w2=rn(ks[11], (all_channels, Cr), 0.2),   # Linear(Call//16 -> Call), no bias
    )


# ----------------------------------------------------------------------------
# Pure-JAX reference (same math, no Pallas) for the correctness check.
# ----------------------------------------------------------------------------
def ref_forward(higerencoder, encoder, decoder, p):
    B, C, H, W = decoder.shape
    x = jnp.transpose(decoder, (0, 2, 3, 1)).reshape(B, H * W, C)
    theta = x @ p["wth"].T + p["bth"]
    phi = x @ p["wph"].T + p["bph"]
    g = x @ p["wg"].T + p["bg"]

    def pool(t):
        Ci = t.shape[-1]
        t = t.reshape(B, H // 2, 2, W // 2, 2, Ci)
        return jnp.max(t, axis=(2, 4)).reshape(B, (H // 2) * (W // 2), Ci)

    phi_p, g_p = pool(phi), pool(g)
    f = jnp.einsum("bnc,bmc->bnm", theta, phi_p)
    attn = jax.nn.softmax(f, axis=-1)
    y = jnp.einsum("bnm,bmc->bnc", attn, g_p)
    wy = y @ p["ww"].T + p["bw"]
    wy = wy * (p["gamma"] / jnp.sqrt(1.0 + BN_EPS)) + p["beta"]
    z = wy + x
    dec_nl = jnp.transpose(z.reshape(B, H, W, C), (0, 3, 1, 2))

    fuse = jnp.concatenate([encoder, dec_nl, higerencoder], axis=1)
    favg = jnp.mean(fuse, axis=(2, 3))
    h = jnp.maximum(favg @ p["w1"].T, 0.0)
    s = jax.nn.sigmoid(h @ p["w2"].T)
    return fuse * s[:, :, None, None]


if __name__ == "__main__":
    key = jax.random.PRNGKey(0)
    B, H, W = 2, 16, 16
    Cin = 16                      # decoder channels (= NonLocalBlock in_channels)
    Cenc, Chigh = 16, 16          # encoder / higher-encoder channels
    Call = Cenc + Cin + Chigh     # all_channels = 48 (reduction 16 -> hidden 3)

    k1, k2, k3, kp = jax.random.split(key, 4)
    higerencoder = jax.random.normal(k1, (B, Chigh, H, W), dtype=jnp.float32)
    encoder = jax.random.normal(k2, (B, Cenc, H, W), dtype=jnp.float32)
    decoder = jax.random.normal(k3, (B, Cin, H, W), dtype=jnp.float32)
    params = init_params(kp, Cin, Call)

    out = jax.block_until_ready(asm_forward(higerencoder, encoder, decoder, params))
    ref = jax.block_until_ready(ref_forward(higerencoder, encoder, decoder, params))
    np.testing.assert_allclose(np.asarray(out), np.asarray(ref), rtol=2e-2, atol=2e-2)
    assert out.shape == (B, Call, H, W)
    print("KERNEL_OK")
</pallas_src>

<mosaic_0001>
module attributes {stable_mosaic.version = 11 : i64} {
  func.func @_asm_kernel(%arg0: i32, %arg1: memref<1x16x256xf32, #tpu.memory_space<vmem>>, %arg2: memref<1x16x256xf32, #tpu.memory_space<vmem>>, %arg3: memref<1x16x256xf32, #tpu.memory_space<vmem>>, %arg4: memref<24x16xbf16, #tpu.memory_space<vmem>>, %arg5: memref<40x1xf32, #tpu.memory_space<vmem>>, %arg6: memref<16x8xbf16, #tpu.memory_space<vmem>>, %arg7: memref<48x3xf32, #tpu.memory_space<vmem>>, %arg8: memref<48x3xf32, #tpu.memory_space<vmem>>, %arg9: memref<1x48x256xf32, #tpu.memory_space<vmem>>) attributes {dimension_semantics = [#tpu.dimension_semantics<parallel>], iteration_bounds = array<i64: 2>, scalar_prefetch = 0 : i64, scratch_operands = 0 : i64, tpu.core_type = #tpu.core_type<tc>, window_params = [{transform_indices = @transform_0, window_bounds = array<i64: 1, 16, 256>}, {transform_indices = @transform_1, window_bounds = array<i64: 1, 16, 256>}, {transform_indices = @transform_2, window_bounds = array<i64: 1, 16, 256>}, {pipeline_mode = #tpu.pipeline_mode<synchronous>, transform_indices = @transform_3, window_bounds = array<i64: 24, 16>}, {pipeline_mode = #tpu.pipeline_mode<synchronous>, transform_indices = @transform_4, window_bounds = array<i64: 40, 1>}, {pipeline_mode = #tpu.pipeline_mode<synchronous>, transform_indices = @transform_5, window_bounds = array<i64: 16, 8>}, {pipeline_mode = #tpu.pipeline_mode<synchronous>, transform_indices = @transform_6, window_bounds = array<i64: 48, 3>}, {pipeline_mode = #tpu.pipeline_mode<synchronous>, transform_indices = @transform_7, window_bounds = array<i64: 48, 3>}, {transform_indices = @transform_8, window_bounds = array<i64: 1, 48, 256>}]} {
    %c0 = arith.constant 0 : index
    %c0_0 = arith.constant 0 : index
    %c0_1 = arith.constant 0 : index
    %0 = vector.load %arg1[%c0, %c0_0, %c0_1] : memref<1x16x256xf32, #tpu.memory_space<vmem>>, vector<1x16x256xf32>
    %1 = vector.shape_cast %0 : vector<1x16x256xf32> to vector<16x256xf32>
    %c0_2 = arith.constant 0 : index
    %c0_3 = arith.constant 0 : index
    %2 = vector.load %arg5[%c0_2, %c0_3] : memref<40x1xf32, #tpu.memory_space<vmem>>, vector<40x1xf32>
    %c0_4 = arith.constant 0 : index
    %c0_5 = arith.constant 0 : index
    %3 = vector.load %arg4[%c0_4, %c0_5] : memref<24x16xbf16, #tpu.memory_space<vmem>>, vector<24x16xbf16>
    %4 = arith.truncf %1 : vector<16x256xf32> to vector<16x256xbf16>
    %cst = arith.constant dense<0.000000e+00> : vector<24x256xf32>
    %5 = tpu.matmul %3, %4, %cst {dimension_numbers = #tpu.dot_dimension_numbers<[1], [0], [0], [1], [0, 0, 1, 1], [], []>} : vector<24x16xbf16>, vector<16x256xbf16>, vector<24x256xf32> -> vector<24x256xf32>
    %6 = vector.extract_strided_slice %2 {offsets = [0, 0], sizes = [24, 1], strides = [1, 1]} : vector<40x1xf32> to vector<24x1xf32>
    %7 = vector.broadcast %6 : vector<24x1xf32> to vector<24x256xf32>
    %8 = arith.addf %5, %7 : vector<24x256xf32>
    %9 = vector.extract_strided_slice %8 {offsets = [0, 0], sizes = [8, 256], strides = [1, 1]} : vector<24x256xf32> to vector<8x256xf32>
    %10 = vector.extract_strided_slice %8 {offsets = [8, 0], sizes = [16, 256], strides = [1, 1]} : vector<24x256xf32> to vector<16x256xf32>
    %11 = vector.extract_strided_slice %10 {offsets = [0, 16], sizes = [16, 240], strides = [1, 1]} : vector<16x256xf32> to vector<16x240xf32>
    %12 = vector.extract_strided_slice %10 {offsets = [0, 0], sizes = [16, 16], strides = [1, 1]} : vector<16x256xf32> to vector<16x16xf32>
    %13 = tpu.concatenate %11, %12 in 1 : vector<16x240xf32>, vector<16x16xf32> -> vector<16x256xf32>
    %14 = arith.maximumf %10, %13 : vector<16x256xf32>
    %15 = vector.extract_strided_slice %14 {offsets = [0, 1], sizes = [16, 255], strides = [1, 1]} : vector<16x256xf32> to vector<16x255xf32>
    %16 = vector.extract_strided_slice %14 {offsets = [0, 0], sizes = [16, 1], strides = [1, 1]} : vector<16x256xf32> to vector<16x1xf32>
    %17 = tpu.concatenate %15, %16 in 1 : vector<16x255xf32>, vector<16x1xf32> -> vector<16x256xf32>
    %18 = arith.maximumf %14, %17 : vector<16x256xf32>
    %19 = vector.extract_strided_slice %18 {offsets = [0, 0], sizes = [8, 256], strides = [1, 1]} : vector<16x256xf32> to vector<8x256xf32>
    %20 = arith.truncf %19 : vector<8x256xf32> to vector<8x256xbf16>
    %21 = vector.extract_strided_slice %18 {offsets = [8, 0], sizes = [8, 256], strides = [1, 1]} : vector<16x256xf32> to vector<8x256xf32>
    %22 = arith.truncf %21 : vector<8x256xf32> to vector<8x256xbf16>
    %c0_6 = arith.constant 0 : index
    %c0_7 = arith.constant 0 : index
    %23 = vector.load %arg6[%c0_6, %c0_7] : memref<16x8xbf16, #tpu.memory_space<vmem>>, vector<16x8xbf16>
    %cst_8 = arith.constant dense<0.000000e+00> : vector<16x256xf32>
    %24 = tpu.matmul %23, %22, %cst_8 {dimension_numbers = #tpu.dot_dimension_numbers<[1], [0], [0], [1], [0, 0, 1, 1], [], []>} : vector<16x8xbf16>, vector<8x256xbf16>, vector<16x256xf32> -> vector<16x256xf32>
    %25 = arith.truncf %9 : vector<8x256xf32> to vector<8x256xbf16>
    %cst_9 = arith.constant dense<0.000000e+00> : vector<256x256xf32>
    %26 = tpu.matmul %20, %25, %cst_9 {dimension_numbers = #tpu.dot_dimension_numbers<[0], [0], [1], [1], [0, 1, 1, 1], [], []>} : vector<8x256xbf16>, vector<8x256xbf16>, vector<256x256xf32> -> vector<256x256xf32>
    %27 = tpu.iota {dimensions = array<i32: 0>} : vector<256x1xi32>
    %c32_i32 = arith.constant 32 : i32
    %c0_i32 = arith.constant 0 : i32
    %28 = arith.cmpi eq, %c32_i32, %c0_i32 : i32
    %c1_i32 = arith.constant 1 : i32
    %29 = arith.select %28, %c1_i32, %c32_i32 : i32
    %30 = vector.broadcast %29 : i32 to vector<256x1xi32>
    %31 = arith.remsi %27, %30 : vector<256x1xi32>
    %c0_i32_10 = arith.constant 0 : i32
    %32 = vector.broadcast %c0_i32_10 : i32 to vector<256x1xi32>
    %33 = arith.cmpi ne, %31, %32 : vector<256x1xi32>
    %c0_i32_11 = arith.constant 0 : i32
    %34 = vector.broadcast %c0_i32_11 : i32 to vector<256x1xi32>
    %35 = arith.cmpi slt, %31, %34 : vector<256x1xi32>
    %c0_i32_12 = arith.constant 0 : i32
    %36 = arith.cmpi slt, %29, %c0_i32_12 : i32
    %37 = vector.broadcast %36 : i1 to vector<256x1xi1>
    %38 = vector.broadcast %37 : vector<256x1xi1> to vector<256x1xi1>
    %39 = arith.xori %35, %38 : vector<256x1xi1>
    %40 = arith.andi %39, %33 : vector<256x1xi1>
    %41 = vector.broadcast %29 : i32 to vector<256x1xi32>
    %42 = arith.addi %31, %41 : vector<256x1xi32>
    %43 = arith.select %40, %42, %31 : vector<256x1xi1>, vector<256x1xi32>
    %c16_i32 = arith.constant 16 : i32
    %44 = vector.broadcast %c16_i32 : i32 to vector<256x1xi32>
    %45 = arith.cmpi slt, %43, %44 : vector<256x1xi32>
    %c2_i32 = arith.constant 2 : i32
    %c0_i32_13 = arith.constant 0 : i32
    %46 = arith.cmpi eq, %c2_i32, %c0_i32_13 : i32
    %c1_i32_14 = arith.constant 1 : i32
    %47 = arith.select %46, %c1_i32_14, %c2_i32 : i32
    %48 = vector.broadcast %47 : i32 to vector<256x1xi32>
    %49 = arith.remsi %27, %48 : vector<256x1xi32>
    %c0_i32_15 = arith.constant 0 : i32
    %50 = vector.broadcast %c0_i32_15 : i32 to vector<256x1xi32>
    %51 = arith.cmpi ne, %49, %50 : vector<256x1xi32>
    %c0_i32_16 = arith.constant 0 : i32
    %52 = vector.broadcast %c0_i32_16 : i32 to vector<256x1xi32>
    %53 = arith.cmpi slt, %49, %52 : vector<256x1xi32>
    %c0_i32_17 = arith.constant 0 : i32
    %54 = arith.cmpi slt, %47, %c0_i32_17 : i32
    %55 = vector.broadcast %54 : i1 to vector<256x1xi1>
    %56 = vector.broadcast %55 : vector<256x1xi1> to vector<256x1xi1>
    %57 = arith.xori %53, %56 : vector<256x1xi1>
    %58 = arith.andi %57, %51 : vector<256x1xi1>
    %59 = vector.broadcast %47 : i32 to vector<256x1xi32>
    %60 = arith.addi %49, %59 : vector<256x1xi32>
    %61 = arith.select %58, %60, %49 : vector<256x1xi1>, vector<256x1xi32>
    %c0_i32_18 = arith.constant 0 : i32
    %62 = vector.broadcast %c0_i32_18 : i32 to vector<256x1xi32>
    %63 = arith.cmpi eq, %61, %62 : vector<256x1xi32>
    %64 = arith.andi %45, %63 : vector<256x1xi1>
    %65 = arith.extui %64 : vector<256x1xi1> to vector<256x1xi32>
    %66 = arith.sitofp %65 : vector<256x1xi32> to vector<256x1xf32>
    %cst_19 = arith.constant dense<0xFF800000> : vector<256xf32>
    %67 = vector.multi_reduction <maximumf>, %26, %cst_19 [0] : vector<256x256xf32> to vector<256xf32>
    %68 = vector.shape_cast %67 : vector<256xf32> to vector<1x256xf32>
    %69 = vector.broadcast %68 : vector<1x256xf32> to vector<256x256xf32>
    %70 = arith.subf %26, %69 : vector<256x256xf32>
    %71 = math.exp %70 : vector<256x256xf32>
    %72 = vector.broadcast %66 : vector<256x1xf32> to vector<256x256xf32>
    %73 = arith.mulf %71, %72 : vector<256x256xf32>
    %cst_20 = arith.constant dense<0.000000e+00> : vector<256xf32>
    %74 = vector.multi_reduction <add>, %73, %cst_20 [0] : vector<256x256xf32> to vector<256xf32>
    %75 = vector.shape_cast %74 : vector<256xf32> to vector<1x256xf32>
    %76 = tpu.reciprocal %75 {approx = true} : vector<1x256xf32> -> vector<1x256xf32>
    %77 = vector.broadcast %76 : vector<1x256xf32> to vector<256x256xf32>
    %78 = arith.mulf %73, %77 : vector<256x256xf32>
    %79 = arith.truncf %78 : vector<256x256xf32> to vector<256x256xbf16>
    %80 = arith.truncf %24 : vector<16x256xf32> to vector<16x256xbf16>
    %cst_21 = arith.constant dense<0.000000e+00> : vector<16x256xf32>
    %81 = tpu.matmul %80, %79, %cst_21 {dimension_numbers = #tpu.dot_dimension_numbers<[1], [0], [0], [1], [0, 0, 1, 1], [], []>} : vector<16x256xbf16>, vector<256x256xbf16>, vector<16x256xf32> -> vector<16x256xf32>
    %82 = vector.extract_strided_slice %2 {offsets = [24, 0], sizes = [16, 1], strides = [1, 1]} : vector<40x1xf32> to vector<16x1xf32>
    %83 = vector.broadcast %82 : vector<16x1xf32> to vector<16x256xf32>
    %84 = arith.addf %81, %83 : vector<16x256xf32>
    %85 = arith.addf %84, %1 : vector<16x256xf32>
    %c0_22 = arith.constant 0 : index
    %c0_23 = arith.constant 0 : index
    %c0_24 = arith.constant 0 : index
    %86 = vector.load %arg2[%c0_22, %c0_23, %c0_24] : memref<1x16x256xf32, #tpu.memory_space<vmem>>, vector<1x16x256xf32>
    %87 = vector.shape_cast %86 : vector<1x16x256xf32> to vector<16x256xf32>
    %c0_25 = arith.constant 0 : index
    %c0_26 = arith.constant 0 : index
    %c0_27 = arith.constant 0 : index
    %88 = vector.load %arg3[%c0_25, %c0_26, %c0_27] : memref<1x16x256xf32, #tpu.memory_space<vmem>>, vector<1x16x256xf32>
    %89 = vector.shape_cast %88 : vector<1x16x256xf32> to vector<16x256xf32>
    %cst_28 = arith.constant dense<0.000000e+00> : vector<16xf32>
    %90 = vector.multi_reduction <add>, %87, %cst_28 [1] : vector<16x256xf32> to vector<16xf32>
    %91 = vector.shape_cast %90 : vector<16xf32> to vector<16x1xf32>
    %cst_29 = arith.constant 3.906250e-03 : f32
    %92 = vector.broadcast %cst_29 : f32 to vector<16x1xf32>
    %93 = arith.mulf %91, %92 : vector<16x1xf32>
    %cst_30 = arith.constant dense<0.000000e+00> : vector<16xf32>
    %94 = vector.multi_reduction <add>, %85, %cst_30 [1] : vector<16x256xf32> to vector<16xf32>
    %95 = vector.shape_cast %94 : vector<16xf32> to vector<16x1xf32>
    %cst_31 = arith.constant 3.906250e-03 : f32
    %96 = vector.broadcast %cst_31 : f32 to vector<16x1xf32>
    %97 = arith.mulf %95, %96 : vector<16x1xf32>
    %cst_32 = arith.constant dense<0.000000e+00> : vector<16xf32>
    %98 = vector.multi_reduction <add>, %89, %cst_32 [1] : vector<16x256xf32> to vector<16xf32>
    %99 = vector.shape_cast %98 : vector<16xf32> to vector<16x1xf32>
    %cst_33 = arith.constant 3.906250e-03 : f32
    %100 = vector.broadcast %cst_33 : f32 to vector<16x1xf32>
    %101 = arith.mulf %99, %100 : vector<16x1xf32>
    %c0_34 = arith.constant 0 : index
    %c0_35 = arith.constant 0 : index
    %102 = vector.load %arg7[%c0_34, %c0_35] : memref<48x3xf32, #tpu.memory_space<vmem>>, vector<48x3xf32>
    %103 = vector.extract_strided_slice %102 {offsets = [0, 0], sizes = [16, 3], strides = [1, 1]} : vector<48x3xf32> to vector<16x3xf32>
    %104 = vector.broadcast %93 : vector<16x1xf32> to vector<16x3xf32>
    %105 = arith.mulf %103, %104 : vector<16x3xf32>
    %cst_36 = arith.constant dense<0.000000e+00> : vector<3xf32>
    %106 = vector.multi_reduction <add>, %105, %cst_36 [0] : vector<16x3xf32> to vector<3xf32>
    %107 = vector.shape_cast %106 : vector<3xf32> to vector<1x3xf32>
    %108 = vector.extract_strided_slice %102 {offsets = [16, 0], sizes = [16, 3], strides = [1, 1]} : vector<48x3xf32> to vector<16x3xf32>
    %109 = vector.broadcast %97 : vector<16x1xf32> to vector<16x3xf32>
    %110 = arith.mulf %108, %109 : vector<16x3xf32>
    %cst_37 = arith.constant dense<0.000000e+00> : vector<3xf32>
    %111 = vector.multi_reduction <add>, %110, %cst_37 [0] : vector<16x3xf32> to vector<3xf32>
    %112 = vector.shape_cast %111 : vector<3xf32> to vector<1x3xf32>
    %113 = arith.addf %107, %112 : vector<1x3xf32>
    %114 = vector.extract_strided_slice %102 {offsets = [32, 0], sizes = [16, 3], strides = [1, 1]} : vector<48x3xf32> to vector<16x3xf32>
    %115 = vector.broadcast %101 : vector<16x1xf32> to vector<16x3xf32>
    %116 = arith.mulf %114, %115 : vector<16x3xf32>
    %cst_38 = arith.constant dense<0.000000e+00> : vector<3xf32>
    %117 = vector.multi_reduction <add>, %116, %cst_38 [0] : vector<16x3xf32> to vector<3xf32>
    %118 = vector.shape_cast %117 : vector<3xf32> to vector<1x3xf32>
    %119 = arith.addf %113, %118 : vector<1x3xf32>
    %cst_39 = arith.constant 0.000000e+00 : f32
    %120 = vector.broadcast %cst_39 : f32 to vector<1x3xf32>
    %121 = arith.maximumf %119, %120 : vector<1x3xf32>
    %c0_40 = arith.constant 0 : index
    %c0_41 = arith.constant 0 : index
    %122 = vector.load %arg8[%c0_40, %c0_41] : memref<48x3xf32, #tpu.memory_space<vmem>>, vector<48x3xf32>
    %123 = vector.broadcast %121 : vector<1x3xf32> to vector<48x3xf32>
    %124 = arith.mulf %122, %123 : vector<48x3xf32>
    %cst_42 = arith.constant dense<0.000000e+00> : vector<48xf32>
    %125 = vector.multi_reduction <add>, %124, %cst_42 [1] : vector<48x3xf32> to vector<48xf32>
    %126 = vector.shape_cast %125 : vector<48xf32> to vector<48x1xf32>
    %127 = arith.negf %126 : vector<48x1xf32>
    %128 = math.exp %127 : vector<48x1xf32>
    %cst_43 = arith.constant 1.000000e+00 : f32
    %129 = vector.broadcast %cst_43 : f32 to vector<48x1xf32>
    %130 = arith.addf %129, %128 : vector<48x1xf32>
    %131 = arith.divf %129, %130 : vector<48x1xf32>
    %132 = vector.extract_strided_slice %131 {offsets = [0, 0], sizes = [16, 1], strides = [1, 1]} : vector<48x1xf32> to vector<16x1xf32>
    %133 = vector.broadcast %132 : vector<16x1xf32> to vector<16x256xf32>
    %134 = arith.mulf %87, %133 : vector<16x256xf32>
    %c0_44 = arith.constant 0 : index
    %c0_45 = arith.constant 0 : index
    %c0_46 = arith.constant 0 : index
    %135 = vector.load %arg9[%c0_44, %c0_45, %c0_46] : memref<1x48x256xf32, #tpu.memory_space<vmem>>, vector<1x16x256xf32>
    %136 = vector.shape_cast %135 : vector<1x16x256xf32> to vector<16x256xf32>
    %137 = vector.shape_cast %134 : vector<16x256xf32> to vector<1x16x256xf32>
    tpu.vector_store %arg9[%c0_44, %c0_45, %c0_46], %137 {strides = array<i32>} : memref<1x48x256xf32, #tpu.memory_space<vmem>>, vector<1x16x256xf32>,
    %138 = vector.extract_strided_slice %131 {offsets = [16, 0], sizes = [16, 1], strides = [1, 1]} : vector<48x1xf32> to vector<16x1xf32>
    %139 = vector.broadcast %138 : vector<16x1xf32> to vector<16x256xf32>
    %140 = arith.mulf %85, %139 : vector<16x256xf32>
    %c0_47 = arith.constant 0 : index
    %c16 = arith.constant 16 : index
    %c0_48 = arith.constant 0 : index
    %141 = vector.load %arg9[%c0_47, %c16, %c0_48] : memref<1x48x256xf32, #tpu.memory_space<vmem>>, vector<1x16x256xf32>
    %142 = vector.shape_cast %141 : vector<1x16x256xf32> to vector<16x256xf32>
    %143 = vector.shape_cast %140 : vector<16x256xf32> to vector<1x16x256xf32>
    tpu.vector_store %arg9[%c0_47, %c16, %c0_48], %143 {strides = array<i32>} : memref<1x48x256xf32, #tpu.memory_space<vmem>>, vector<1x16x256xf32>,
    %144 = vector.extract_strided_slice %131 {offsets = [32, 0], sizes = [16, 1], strides = [1, 1]} : vector<48x1xf32> to vector<16x1xf32>
    %145 = vector.broadcast %144 : vector<16x1xf32> to vector<16x256xf32>
    %146 = arith.mulf %89, %145 : vector<16x256xf32>
    %c0_49 = arith.constant 0 : index
    %c32 = arith.constant 32 : index
    %c0_50 = arith.constant 0 : index
    %147 = vector.load %arg9[%c0_49, %c32, %c0_50] : memref<1x48x256xf32, #tpu.memory_space<vmem>>, vector<1x16x256xf32>
    %148 = vector.shape_cast %147 : vector<1x16x256xf32> to vector<16x256xf32>
    %149 = vector.shape_cast %146 : vector<16x256xf32> to vector<1x16x256xf32>
    tpu.vector_store %arg9[%c0_49, %c32, %c0_50], %149 {strides = array<i32>} : memref<1x48x256xf32, #tpu.memory_space<vmem>>, vector<1x16x256xf32>,
    return
  }
  func.func @transform_0(%arg0: i32) -> (i32, i32, i32) {
    %c0_i32 = arith.constant 0 : i32
    %c0_i32_0 = arith.constant 0 : i32
    %c0_i32_1 = arith.constant 0 : i32
    return %arg0, %c0_i32, %c0_i32_0 : i32, i32, i32
  }
  func.func @transform_1(%arg0: i32) -> (i32, i32, i32) {
    %c0_i32 = arith.constant 0 : i32
    %c0_i32_0 = arith.constant 0 : i32
    %c0_i32_1 = arith.constant 0 : i32
    return %arg0, %c0_i32, %c0_i32_0 : i32, i32, i32
  }
  func.func @transform_2(%arg0: i32) -> (i32, i32, i32) {
    %c0_i32 = arith.constant 0 : i32
    %c0_i32_0 = arith.constant 0 : i32
    %c0_i32_1 = arith.constant 0 : i32
    return %arg0, %c0_i32, %c0_i32_0 : i32, i32, i32
  }
  func.func @transform_3(%arg0: i32) -> (i32, i32) {
    %c0_i32 = arith.constant 0 : i32
    %c0_i32_0 = arith.constant 0 : i32
    %c0_i32_1 = arith.constant 0 : i32
    return %c0_i32, %c0_i32_0 : i32, i32
  }
  func.func @transform_4(%arg0: i32) -> (i32, i32) {
    %c0_i32 = arith.constant 0 : i32
    %c0_i32_0 = arith.constant 0 : i32
    %c0_i32_1 = arith.constant 0 : i32
    return %c0_i32, %c0_i32_0 : i32, i32
  }
  func.func @transform_5(%arg0: i32) -> (i32, i32) {
    %c0_i32 = arith.constant 0 : i32
    %c0_i32_0 = arith.constant 0 : i32
    %c0_i32_1 = arith.constant 0 : i32
    return %c0_i32, %c0_i32_0 : i32, i32
  }
  func.func @transform_6(%arg0: i32) -> (i32, i32) {
    %c0_i32 = arith.constant 0 : i32
    %c0_i32_0 = arith.constant 0 : i32
    %c0_i32_1 = arith.constant 0 : i32
    return %c0_i32, %c0_i32_0 : i32, i32
  }
  func.func @transform_7(%arg0: i32) -> (i32, i32) {
    %c0_i32 = arith.constant 0 : i32
    %c0_i32_0 = arith.constant 0 : i32
    %c0_i32_1 = arith.constant 0 : i32
    return %c0_i32, %c0_i32_0 : i32, i32
  }
  func.func @transform_8(%arg0: i32) -> (i32, i32, i32) {
    %c0_i32 = arith.constant 0 : i32
    %c0_i32_0 = arith.constant 0 : i32
    %c0_i32_1 = arith.constant 0 : i32
    return %arg0, %c0_i32, %c0_i32_0 : i32, i32, i32
  }
}

</mosaic_0001>

<bundles_post_ra>
// kernel: tpu_custom_call.1
= control target key start
LH: loop header
LB: loop body
LE: loop exit
PB: predicated region body
PF: predicated region fallthrough
CT: control target
= control target key end

     0   :  { %13 = vsyncpa [#allocation3], 0  ;;  %s4582_s0 = inlined_call_operand.vmem [shape: f32[2,16,256], index: 0, kind: input, shape index: {}]   ;;  %s4583_s1 = inlined_call_operand.vmem [shape: f32[2,16,256], index: 1, kind: input, shape index: {}]   ;;  %s4584_s2 = inlined_call_operand.hbm [shape: f32[2,16,256], index: 2, kind: input, shape index: {}]   ;;  %s4585_s3 = inlined_call_operand.vmem [shape: bf16[24,16], index: 3, kind: input, shape index: {}]   ;;  %s4586_s4 = inlined_call_operand.vmem [shape: f32[40,1], index: 4, kind: input, shape index: {}]   ;;  %s4587_s5 = inlined_call_operand.vmem [shape: bf16[16,8], index: 5, kind: input, shape index: {}]   ;;  %s4588_s6 = inlined_call_operand.vmem [shape: f32[48,3], index: 6, kind: input, shape index: {}]   ;;  %s4589_s7 = inlined_call_operand.vmem [shape: f32[48,3], index: 7, kind: input, shape index: {}]   ;;  %s4590_s8 = inlined_call_operand.hbm [shape: f32[2,48,256], index: 8, kind: output, shape index: {}]  }
   0x1   :  { %15 = vsyncpa [#allocation3 + $0x1], 0 }
   0x2   :  { %16 = vsyncpa [#allocation4], 0 }
   0x3   :  { %18 = vsyncpa [#allocation4 + $0x1], 0  ;;  %s3116_s27 = smov 0   ;;  %s3118_s28 = smov 0  }
   0x4   :  { %s3120_s29 = smov 0   ;;  %s3122_s30 = smov 0  }
   0x5 LB: > { %s3137_s9 = sadd.s32 4294967295, %s3059_s30   ;;  %s2658_s10 = sadd.s32 4294967294, %s3059_s30   ;;  %s3059_s30 = sphi %s3122_s30, %s4847_s30   ;;  %s3055_s29 = sphi %s3120_s29, %s4846_s29   ;;  %s3051_s28 = sphi %s3118_s28, %s4845_s28   ;;  %s3047_s27 = sphi %s3116_s27, %s4844_s27  }
   0x6   : > { %s3141_s11 = sadd.s32 1, %s3059_s30   ;;  %s83_s12 = sadd.s32 1, %s3055_s29 }
   0x7   : > { %s80_s13 = ssub.s32 %s3059_s30, %s3141_s11  ;;  %p90_p0 = scmp.ne.s32.totalorder %s3055_s29, %s3051_s28 }
   0x8   : > { %p81_p1 = scmp.eq.s32.totalorder %s80_s13, 0  ;;  %p91_p2 = scmp.eq.s32.totalorder %s3059_s30, 0 }
   0x9   : > { %p96_p3 = scmp.ne.s32.totalorder %s3051_s28, %s3047_s27  ;;  %p97_p4 = scmp.eq.s32.totalorder %s3137_s9, 0 }
   0xa   : > { %s3153_s14 = scalar_select %p81_p1, %s3055_s29, %s83_s12  }
   0xb   : > { %p3155_p5 = por %p91_p2, %p90_p0  ;;  %p3159_p6 = por %p97_p4, %p96_p3 }
   0xc   : > { %p225_p7 = scmp.eq.s32.totalorder %s3137_s9, 1  ;;  %p231_p8 = scmp.eq.s32.totalorder %s2658_s10, 1 }
   0xd   : > { %p2736_p10 = scmp.lt.s32.totalorder %s3059_s30, 2  ;;  %s282_s19 = sand.u32 1, %s3055_s29  }
   0xe   : > { %p3166_p11 = por %p225_p7, %p90_p0  ;;  %p3170_p12 = por %p231_p8, %p96_p3 }
   0xf   : > { %s2719_s20 = sshll.u32 %s3059_s30, 9  ;;  %s2661_s21 = sshll.u32 %s282_s19, 5 }
  0x10   : > { %s4660_s17 = scalar_select %p3166_p11, 1, 0 }
  0x11   : > { %s4661_s18 = scalar_select %p3170_p12, 1, 0 }
  0x12   : > { %s3179_s24 = scalar_lea.hbm %s4584_s2, %s2719_s20  ;;  %s286_s25 = scalar_lea.vmem [#allocation2], %s2661_s21 }
  0x13   : > { %s293_s26 = sshll.u32 %s286_s25, 4  ;;  %p3183_p13 = pnand %p2736_p10, %p3155_p5  ;;  %s3187_s26 = int_to_ptr.vmem [resolvable:$true] %s293_s26 }
  0x14   : > { %s3189_s12 = scalar_lea.sflag [#allocation3], %s282_s19  ;;  %s2963_s13 = scalar_lea.hbm %s3179_s24, 512 }
  0x15   : > { %p2964_p0 = scmp.ne.s32.totalorder %s3179_s24, %s2963_s13  ;;  %p2965_p1 = pneg %p3183_p13 }
  0x16   : > { %s2968_s21 = scalar_lea.hbm %s4584_s2, 1024  ;;  %p2969_p4 = scmp.lt.u32.totalorder %s3179_s24, %s4584_s2 }
  0x17   : > { %p2966_p2 = pnand %p2965_p1, %p2964_p0  ;;  %p2970_p5 = scmp.lt.u32.totalorder %s2968_s21, %s2963_s13 }
  0x18   : > { %p2972_p8 = scmp.lt.u32.totalorder %s2963_s13, %s3179_s24 }
  0x19   : > { %p2967_p3 = pneg %p2966_p2  ;;  %p2971_p7 = por %p2970_p5, %p2969_p4 }
  0x1b   : > { %p2973_p10 = por %p2972_p8, %p2971_p7 }
  0x1d   : > { %p2974_p9 = pnand %p2973_p10, %p2967_p3 }
  0x1f   : > { %2977 = shalt.err (!%p2974_p9)
}
  0x20   : > { %s2978_s19 = scalar_lea.vmem %s3187_s26, 512  ;;  %s3061_s25 = smov [#allocation2]  }
  0x21   : > { %p2979_p0 = scmp.ne.s32.totalorder %s3187_s26, %s2978_s19  ;;  %s2983_s20 = sshll.u32 %s3061_s25, 4  ;;  %s2984_s20 = int_to_ptr.vmem [resolvable:$false] %s2983_s20 }
  0x22   : > { %s2985_s15 = scalar_lea.vmem %s2984_s20, 1024  ;;  %p2986_p11 = scmp.lt.s32.totalorder %s3187_s26, %s2984_s20 }
  0x23   : > { %p2981_p2 = pnand %p2979_p0, %p2965_p1  ;;  %p2987_p4 = scmp.lt.s32.totalorder %s2985_s15, %s2978_s19 }
  0x25   : > { %p2982_p12 = pneg %p2981_p2  ;;  %p2988_p5 = por %p2987_p4, %p2986_p11 }
  0x27   : > { %p2989_p7 = pnand %p2988_p5, %p2982_p12 }
  0x29   : > { %2992 = shalt.err (!%p2989_p7)
}
  0x2a   : > { %s3062_s13 = smov 256   ;;  %s3063_s21 = smov 16  }
  0x2b   : > { %2731 = dma.hbm_to_vmem [thread:$0]  (!%p3183_p13), %s3179_s24, 512, %s3187_s26, %s3189_s12, %s3062_s13, %s3062_s13, %s3063_s21  }
  0x2c   : > { %p2664_p9 = scmp.ge.s32.totalorder %s3059_s30, 1  ;;  %p301_p1 = scmp.lt.s32.totalorder %s3059_s30, 3 }
  0x2e   : > { %p302_p3 = pnand %p2664_p9, %p301_p1 }
  0x30   : > { %305 = sbr.rel (%p302_p3) target bundleno = 1784 (0x6f8), region = 52 }
  0x37   : > { %s3220_s22 = sand.u32 1, %s3051_s28  }
  0x38   : > { %s2665_s23 = sshll.u32 %s3220_s22, 5  ;;  %s308_s19 = scalar_lea.sflag [#allocation3], %s3220_s22 }
  0x39   : > { %s3224_s25 = scalar_lea.vmem [#allocation2], %s2665_s23 }
  0x3a   : > { %3038 = dma.done.wait (%p3159_p6), %s308_s19, 512  }
  0x3b   : > { %3040 = vsyncadd (%p3159_p6), %s308_s19, 4294966784  ;;  %p354_p11 = scmp.lt.s32.totalorder %s3137_s9, 1  ;;  %v3064_v0 = vmov 0   ;;  %v370_v7 = vld [vmem:[%s4586_s4 + $0x8] sm:$0xff]  ;;  %v2800_v8 = vld [vmem:[%s4585_s3] sm:$0xff]   ;;  %vm402_vm0 = vcmask 130048  }
  0x3c   : > { %441 = vmatprep.mubr.bf16.mxu0 %v3064_v0  ;;  %2778 = vset.pattern.permute.xlu0 %v3064_v0  ;;  %v2801_v17 = vld [vmem:[%s4585_s3 + $0x8] ss:$0 sps:$4 sm:$0xff]   ;;  %s3065_s16 = smov 112   ;;  %vm472_vm1 = vcmask 916480   ;;  %s3066_s10 = smov 127   ;;  %v369_v26 = vld [vmem:[%s4586_s4] sm:$0xff] }
  0x3d   : > { %s3234_s24 = scalar_select %p354_p11, %s3137_s9, 1  ;;  %2789 = vset.pattern.permute.xlu1 %v3064_v0  ;;  %699 = vmatprep.mubr.bf16.mxu1 %v3064_v0  ;;  %vm499_vm2 = vcmask 1039360   ;;  %vm529_vm3 = vcmask 1043456   ;;  %v371_v45 = vld [vmem:[%s4586_s4 + $0x10] sm:$0xff]  ;;  %vm525_vm4 = vcmask 64512   ;;  %v372_v60 = vld [vmem:[%s4586_s4 + $0x18] sm:$0xff] }
  0x3e   : > { %386 = vperm.xlu0 %2778, %v370_v7   ;;  %s2548_s20 = scalar_lea.sflag [#allocation4], %s3220_s22  ;;  %p4841_p12 = scmp.ne.s32.totalorder %s4660_s17, 0 }
  0x3f   : > { %s2720_s26 = sshll.u32 %s3234_s24, 5  ;;  %s2722_s24 = smul.u32 96, %s3220_s22 }
  0x40   : > { %s3244_s12 = scalar_lea.vmem %s4582_s0, %s2720_s26  ;;  %s363_s23 = scalar_lea.vmem %s4583_s1, %s2720_s26 }
  0x41   : > { %v366_v1 = vld [vmem:[%s3244_s12 + $0x8] sm:$0xff]  ;;  %v368_v2 = vld [vmem:[%s3244_s12 + $0x18] sm:$0xff]  ;;  %v365_v3 = vld [vmem:[%s3244_s12] sm:$0xff]  ;;  %s2723_s26 = smul.u32 1536, %s3137_s9  ;;  %s3068_s15 = smov [#allocation5]  }
  0x42   : > { %v378_v4 = vpack.c.bf16 %v368_v2, %v366_v1  ;;  %v367_v5 = vld [vmem:[%s3244_s12 + $0x10] sm:$0xff]  ;;  %s2997_s13 = sshll.u32 %s3068_s15, 4  ;;  %s2998_s13 = int_to_ptr.vmem [resolvable:$false] %s2997_s13 }
  0x43   : > { %v377_v6 = vpack.c.bf16 %v367_v5, %v365_v3  ;;  %s4534_s9 = scalar_lea.hbm %s4590_s8, %s2723_s26  ;;  %s2999_s21 = scalar_lea.vmem %s2998_s13, 3072 }
  0x44   : > { %409 = vmatprep.subr.bf16.mxu0 %v378_v4 }
  0x45   : > { %410 = vmatpush1.bf16.msra.mxu0 %v377_v6 }
  0x48   : > { %2672 = vmatmul.mubr.msk.bf16.vlgmr.msra.gmra.mrb[0].mxu0 %vm402_vm0, %v2800_v8 }
  0x49   : > { %451 = vmatprep.mubr.bf16.mxu0 %v3064_v0 }
  0x50   : > { %2673 = vmatmul.mubr.msk.bf16.gmra.mrb[4].mxu0 %vm402_vm0, %v2801_v17 }
  0x51   : > { %568 = vmatprep.mubr.bf16.mxu0 %v3064_v0 }
  0xbd   : > { %v387_v10 = vpop.permute.xlu0 %386 }
 0x11b   : > { %v443_v9 = vpop.f32.mrb[0].mxu0 }
 0x11c   : > { %v445_v11 = vpop.f32.mrb[1].mxu0 }
 0x11d   : > { %v447_v12 = vpop.f32.mrb[2].mxu0 }
 0x11e   : > { %v448_v13 = vadd.f32 %v447_v12, %v387_v10  ;;  %v449_v14 = vpop.f32.mrb[3].mxu0 }
 0x11f   : > { %v450_v15 = vadd.f32 %v449_v14, %v387_v10 }
 0x121   : > { %v2779_v16 = vpack.i.bf16 %v450_v15, %v448_v13 }
 0x123   : > { %2780 = vrot.lane.b32.xlu0 %v2779_v16, %s3065_s16  ;;  %v453_v42 = vpop.f32.mrb[4].mxu0 }
 0x124   : > { %v455_v43 = vpop.f32.mrb[5].mxu0 }
 0x125   : > { %v457_v44 = vpop.f32.mrb[6].mxu0 }
 0x126   : > { %v458_v46 = vpop.f32.mrb[7].mxu0 }
 0x195   : > { %v2781_v18 = vpop.permute.xlu0 %2780 }
 0x196   : > { %v2783_v19 = vunpack.i.h.bf16 %v2781_v18  ;;  %v2782_v20 = vunpack.i.l.bf16 %v2781_v18 }
 0x198   : > { %v473_v21 = vsel %vm472_vm1, %v2782_v20, %v2783_v19  ;;  %v481_v22 = vsel %vm472_vm1, %v2783_v19, %v2782_v20 }
 0x199   : > { %v483_v23 = vmax.f32 %v448_v13, %v473_v21  ;;  %v484_v24 = vmax.f32 %v450_v15, %v481_v22 }
 0x19b   : > { %v2784_v25 = vpack.i.bf16 %v484_v24, %v483_v23 }
 0x19d   : > { %2785 = vrot.lane.b32.xlu1 %v2784_v25, %s3066_s10 }
 0x1a1   : > { %381 = vperm.xlu1 %2789, %v369_v26  }
 0x20f   : > { %v2786_v27 = vpop.permute.xlu1 %2785 }
 0x210   : > { %v2788_v28 = vunpack.i.h.bf16 %v2786_v27  ;;  %v2787_v29 = vunpack.i.l.bf16 %v2786_v27 }
 0x212   : > { %v508_v30 = vsel %vm499_vm2, %v2788_v28, %v2787_v29  ;;  %v500_v31 = vsel %vm499_vm2, %v2787_v29, %v2788_v28 }
 0x213   : > { %v511_v32 = vmax.f32 %v484_v24, %v508_v30  ;;  %v510_v33 = vmax.f32 %v483_v23, %v500_v31 }
 0x215   : > { %v515_v34 = vpack.c.bf16 %v511_v32, %v511_v32  ;;  %v514_v35 = vpack.c.bf16 %v510_v33, %v510_v33 }
 0x217   : > { %597 = vxpose.xlu1.c.b16.start.end [1/1] (short) %v515_v34, 128  ;;  %581 = vxpose.xlu0.c.b16.start.end [1/1] (short) %v514_v35, 128 }
 0x220   : > { %v382_v36 = vpop.permute.xlu1 %381 }
 0x221   : > { %v444_v37 = vadd.f32 %v443_v9, %v382_v36  ;;  %v446_v38 = vadd.f32 %v445_v11, %v382_v36 }
 0x223   : > { %v579_v39 = vpack.c.bf16 %v444_v37, %v444_v37  ;;  %v580_v40 = vpack.c.bf16 %v446_v38, %v446_v38 }
 0x225   : > { %2677 = vmatprep.subr.msk.bf16.mxu1 %vm529_vm3, %v580_v40  ;;  %v662_v41 = vsel %vm529_vm3, %v579_v39, 0 }
 0x226   : > { %668 = vmatpush1.bf16.msra.mxu1 %v662_v41 }
 0x23c   : > { %391 = vperm.xlu0 %2778, %v371_v45  }
 0x27d   : > { %v589_v47 = vpop.trf.xlu0  ;;  %v605_v56 = vpop.trf.xlu1 }
 0x27e   : > { %2678 = vmatmul.mubr.msk.bf16.vlgmr.msra.gmra.mrb[0].mxu1 %vm525_vm4, %v589_v47 }
 0x27f   : > { %709 = vmatprep.mubr.bf16.mxu1 %v3064_v0 }
 0x281   : > { %v590_v48 = vpop.trf.xlu0  ;;  %v606_v61 = vpop.trf.xlu1 }
 0x285   : > { %v591_v49 = vpop.trf.xlu0  ;;  %v607_v62 = vpop.trf.xlu1 }
 0x286   : > { %2679 = vmatmul.mubr.msk.bf16.gmra.mrb[4].mxu1 %vm525_vm4, %v590_v48 }
 0x287   : > { %719 = vmatprep.mubr.bf16.mxu1 %v3064_v0 }
 0x289   : > { %v592_v50 = vpop.trf.xlu0  ;;  %v608_v63 = vpop.trf.xlu1 }
 0x28d   : > { %v593_v51 = vpop.trf.xlu0  ;;  %v609_v1 = vpop.trf.xlu1 }
 0x28e   : > { %2680 = vmatmul.mubr.msk.bf16.gmra.mrb[8].mxu1 %vm525_vm4, %v591_v49 }
 0x28f   : > { %729 = vmatprep.mubr.bf16.mxu1 %v3064_v0 }
 0x291   : > { %v594_v52 = vpop.trf.xlu0  ;;  %v610_v2 = vpop.trf.xlu1 }
 0x295   : > { %v595_v53 = vpop.trf.xlu0  ;;  %v611_v3 = vpop.trf.xlu1 }
 0x296   : > { %2681 = vmatmul.mubr.msk.bf16.gmra.mrb[12].mxu1 %vm525_vm4, %v592_v50 }
 0x297   : > { %739 = vmatprep.mubr.bf16.mxu1 %v3064_v0 }
 0x299   : > { %v596_v54 = vpop.trf.xlu0  ;;  %v612_v4 = vpop.trf.xlu1 }
 0x29e   : > { %2682 = vmatmul.mubr.msk.bf16.gmra.mrb[16].mxu1 %vm525_vm4, %v593_v51 }
 0x29f   : > { %749 = vmatprep.mubr.bf16.mxu1 %v3064_v0 }
 0x2a6   : > { %2683 = vmatmul.mubr.msk.bf16.gmra.mrb[20].mxu1 %vm525_vm4, %v594_v52 }
 0x2a7   : > { %759 = vmatprep.mubr.bf16.mxu1 %v3064_v0 }
 0x2ae   : > { %2684 = vmatmul.mubr.msk.bf16.gmra.mrb[24].mxu1 %vm525_vm4, %v595_v53 }
 0x2af   : > { %769 = vmatprep.mubr.bf16.mxu1 %v3064_v0 }
 0x2b6   : > { %2685 = vmatmul.mubr.msk.bf16.gmra.mrb[28].mxu1 %vm525_vm4, %v596_v54 }
 0x2b7   : > { %779 = vmatprep.mubr.bf16.mxu1 %v3064_v0 }
 0x2bb   : > { %v392_v55 = vpop.permute.xlu0 %391 }
 0x2bc   : > { %v454_v57 = vadd.f32 %v453_v42, %v392_v55  ;;  %v456_v58 = vadd.f32 %v455_v43, %v392_v55 }
 0x2be   : > { %v2790_v59 = vpack.i.bf16 %v456_v58, %v454_v57  ;;  %2686 = vmatmul.mubr.msk.bf16.gmra.mrb[32].mxu1 %vm525_vm4, %v605_v56 }
 0x2bf   : > { %789 = vmatprep.mubr.bf16.mxu1 %v3064_v0 }
 0x2c0   : > { %2791 = vrot.lane.b32.xlu1 %v2790_v59, %s3065_s16 }
 0x2c4   : > { %2327 = vperm.xlu1 %2789, %v372_v60  }
 0x2c6   : > { %2687 = vmatmul.mubr.msk.bf16.gmra.mrb[36].mxu1 %vm525_vm4, %v606_v61 }
 0x2c7   : > { %799 = vmatprep.mubr.bf16.mxu1 %v3064_v0 }
 0x2ce   : > { %2688 = vmatmul.mubr.msk.bf16.gmra.mrb[40].mxu1 %vm525_vm4, %v607_v62 }
 0x2cf   : > { %809 = vmatprep.mubr.bf16.mxu1 %v3064_v0 }
 0x2d6   : > { %2689 = vmatmul.mubr.msk.bf16.gmra.mrb[44].mxu1 %vm525_vm4, %v608_v63 }
 0x2d7   : > { %819 = vmatprep.mubr.bf16.mxu1 %v3064_v0 }
 0x2de   : > { %2690 = vmatmul.mubr.msk.bf16.gmra.mrb[48].mxu1 %vm525_vm4, %v609_v1 }
 0x2df   : > { %829 = vmatprep.mubr.bf16.mxu1 %v3064_v0 }
 0x2e6   : > { %2691 = vmatmul.mubr.msk.bf16.gmra.mrb[52].mxu1 %vm525_vm4, %v610_v2 }
 0x2e7   : > { %839 = vmatprep.mubr.bf16.mxu1 %v3064_v0 }
 0x2ee   : > { %2692 = vmatmul.mubr.msk.bf16.gmra.mrb[56].mxu1 %vm525_vm4, %v611_v3 }
 0x2ef   : > { %849 = vmatprep.mubr.bf16.mxu1 %v3064_v0  ;;  %v373_v0 = vld [vmem:[%s4586_s4 + $0x20] sm:$0xff] }
 0x2f6   : > { %2693 = vmatmul.mubr.msk.bf16.gmra.mrb[60].mxu1 %vm525_vm4, %v612_v4 }
 0x332   : > { %v2792_v5 = vpop.permute.xlu1 %2791 }
 0x333   : > { %v2794_v6 = vunpack.i.h.bf16 %v2792_v5  ;;  %v2793_v7 = vunpack.i.l.bf16 %v2792_v5 }
 0x335   : > { %v474_v8 = vsel %vm472_vm1, %v2793_v7, %v2794_v6  ;;  %v482_v9 = vsel %vm472_vm1, %v2794_v6, %v2793_v7 }
 0x336   : > { %v3312_v10 = vmax.f32 %v454_v57, %v474_v8  ;;  %v3314_v11 = vmax.f32 %v456_v58, %v482_v9 }
 0x338   : > { %v2795_v12 = vpack.i.bf16 %v3314_v11, %v3312_v10 }
 0x33a   : > { %2796 = vrot.lane.b32.xlu0 %v2795_v12, %s3066_s10 }
 0x33e   : > { %2332 = vperm.xlu0 %2778, %v373_v0  }
 0x351   : > { %v3322_v13 = vpop.f32.mrb[0].mxu1 }
 0x352   : > { %v3324_v14 = vpop.f32.mrb[1].mxu1 }
 0x353   : > { %v3326_v15 = vpop.f32.mrb[2].mxu1 }
 0x354   : > { %v3328_v16 = vpop.f32.mrb[3].mxu1 }
 0x359   : > { %v3330_v17 = vpop.f32.mrb[4].mxu1 }
 0x35a   : > { %v1821_v18 = vmax.f32 %v3322_v13, %v3330_v17  ;;  %v3334_v19 = vpop.f32.mrb[5].mxu1 }
 0x35b   : > { %v1858_v20 = vmax.f32 %v3324_v14, %v3334_v19  ;;  %v3338_v21 = vpop.f32.mrb[6].mxu1 }
 0x35c   : > { %v1822_v22 = vmax.f32 %v3326_v15, %v3338_v21  ;;  %v3342_v23 = vpop.f32.mrb[7].mxu1 }
 0x35d   : > { %v1859_v24 = vmax.f32 %v3328_v16, %v3342_v23 }
 0x361   : > { %v3346_v25 = vpop.f32.mrb[8].mxu1 }
 0x362   : > { %v1823_v26 = vmax.f32 %v1821_v18, %v3346_v25  ;;  %v3349_v27 = vpop.f32.mrb[9].mxu1 }
 0x363   : > { %v1860_v28 = vmax.f32 %v1858_v20, %v3349_v27  ;;  %v3352_v29 = vpop.f32.mrb[10].mxu1 }
 0x364   : > { %v1824_v30 = vmax.f32 %v1822_v22, %v3352_v29  ;;  %v3355_v31 = vpop.f32.mrb[11].mxu1 }
 0x365   : > { %v1861_v32 = vmax.f32 %v1859_v24, %v3355_v31 }
 0x369   : > { %v3358_v33 = vpop.f32.mrb[12].mxu1 }
 0x36a   : > { %v1825_v34 = vmax.f32 %v1823_v26, %v3358_v33  ;;  %v3361_v35 = vpop.f32.mrb[13].mxu1 }
 0x36b   : > { %v1862_v36 = vmax.f32 %v1860_v28, %v3361_v35  ;;  %v3364_v37 = vpop.f32.mrb[14].mxu1 }
 0x36c   : > { %v1826_v38 = vmax.f32 %v1824_v30, %v3364_v37  ;;  %v3367_v39 = vpop.f32.mrb[15].mxu1 }
 0x36d   : > { %v1863_v40 = vmax.f32 %v1861_v32, %v3367_v39 }
 0x371   : > { %v3370_v41 = vpop.f32.mrb[16].mxu1 }
 0x372   : > { %v1827_v42 = vmax.f32 %v1825_v34, %v3370_v41  ;;  %v3373_v43 = vpop.f32.mrb[17].mxu1 }
 0x373   : > { %v1864_v44 = vmax.f32 %v1862_v36, %v3373_v43  ;;  %v3376_v45 = vpop.f32.mrb[18].mxu1 }
 0x374   : > { %v1828_v46 = vmax.f32 %v1826_v38, %v3376_v45  ;;  %v3379_v47 = vpop.f32.mrb[19].mxu1 }
 0x375   : > { %v1865_v48 = vmax.f32 %v1863_v40, %v3379_v47 }
 0x379   : > { %v3382_v49 = vpop.f32.mrb[20].mxu1 }
 0x37a   : > { %v1829_v50 = vmax.f32 %v1827_v42, %v3382_v49  ;;  %v3385_v51 = vpop.f32.mrb[21].mxu1 }
 0x37b   : > { %4663 = vst [vmem:[#allocation8_spill] sm:$0xff] %v3385_v51  ;;  %v1866_v52 = vmax.f32 %v1864_v44, %v3385_v51  ;;  %v3388_v53 = vpop.f32.mrb[22].mxu1 }
 0x37c   : > { %v1830_v54 = vmax.f32 %v1828_v46, %v3388_v53  ;;  %v3391_v55 = vpop.f32.mrb[23].mxu1 }
 0x37d   : > { %4664 = vst [vmem:[#allocation9_spill] sm:$0xff] %v3391_v55  ;;  %v1867_v56 = vmax.f32 %v1865_v48, %v3391_v55 }
 0x381   : > { %v3394_v57 = vpop.f32.mrb[24].mxu1 }
 0x382   : > { %v1831_v58 = vmax.f32 %v1829_v50, %v3394_v57  ;;  %v3397_v59 = vpop.f32.mrb[25].mxu1 }
 0x383   : > { %4665 = vst [vmem:[#allocation10_spill] sm:$0xff] %v3397_v59  ;;  %v1868_v60 = vmax.f32 %v1866_v52, %v3397_v59  ;;  %v3400_v61 = vpop.f32.mrb[26].mxu1 }
 0x384   : > { %v1832_v62 = vmax.f32 %v1830_v54, %v3400_v61  ;;  %v3403_v63 = vpop.f32.mrb[27].mxu1 }
 0x385   : > { %4666 = vst [vmem:[#allocation11_spill] sm:$0xff] %v3403_v63  ;;  %v1869_v1 = vmax.f32 %v1867_v56, %v3403_v63 }
 0x389   : > { %v3406_v2 = vpop.f32.mrb[28].mxu1 }
 0x38a   : > { %v1833_v3 = vmax.f32 %v1831_v58, %v3406_v2  ;;  %v3409_v4 = vpop.f32.mrb[29].mxu1 }
 0x38b   : > { %4667 = vst [vmem:[#allocation12_spill] sm:$0xff] %v3409_v4  ;;  %v1870_v5 = vmax.f32 %v1868_v60, %v3409_v4  ;;  %v3412_v6 = vpop.f32.mrb[30].mxu1 }
 0x38c   : > { %v1834_v7 = vmax.f32 %v1832_v62, %v3412_v6  ;;  %v3415_v8 = vpop.f32.mrb[31].mxu1 }
 0x38d   : > { %4668 = vst [vmem:[#allocation13_spill] sm:$0xff] %v3415_v8  ;;  %v1871_v9 = vmax.f32 %v1869_v1, %v3415_v8 }
 0x391   : > { %v3418_v12 = vpop.f32.mrb[32].mxu1 }
 0x392   : > { %v1835_v0 = vmax.f32 %v1833_v3, %v3418_v12  ;;  %v3421_v18 = vpop.f32.mrb[33].mxu1 }
 0x393   : > { %4669 = vst [vmem:[#allocation14_spill] sm:$0xff] %v3421_v18  ;;  %v1872_v20 = vmax.f32 %v1870_v5, %v3421_v18  ;;  %v3424_v22 = vpop.f32.mrb[34].mxu1 }
 0x394   : > { %v1836_v24 = vmax.f32 %v1834_v7, %v3424_v22  ;;  %v3427_v26 = vpop.f32.mrb[35].mxu1 }
 0x395   : > { %4670 = vst [vmem:[#allocation15_spill] sm:$0xff] %v3427_v26  ;;  %v1873_v28 = vmax.f32 %v1871_v9, %v3427_v26 }
 0x399   : > { %v3430_v30 = vpop.f32.mrb[36].mxu1 }
 0x39a   : > { %v1837_v32 = vmax.f32 %v1835_v0, %v3430_v30  ;;  %v3433_v34 = vpop.f32.mrb[37].mxu1 }
 0x39b   : > { %4671 = vst [vmem:[#allocation16_spill] sm:$0xff] %v3433_v34  ;;  %v1874_v36 = vmax.f32 %v1872_v20, %v3433_v34  ;;  %v3436_v38 = vpop.f32.mrb[38].mxu1 }
 0x39c   : > { %v1838_v40 = vmax.f32 %v1836_v24, %v3436_v38  ;;  %v3439_v42 = vpop.f32.mrb[39].mxu1 }
 0x39d   : > { %4672 = vst [vmem:[#allocation17_spill] sm:$0xff] %v3439_v42  ;;  %v1875_v44 = vmax.f32 %v1873_v28, %v3439_v42  ;;  %v860_v42 = vlaneseq }
 0x39f   : > { %v3524_v18 = vshrl.u32 %v860_v42, 7 }
 0x3a1   : > { %v3442_v46 = vpop.f32.mrb[40].mxu1  ;;  %v1313_v55 = vand.u32 1, %v3524_v18  ;;  %v873_v42 = vadd.s32 96, %v3524_v18 }
 0x3a2   : > { %v1839_v48 = vmax.f32 %v1837_v32, %v3442_v46  ;;  %v3445_v50 = vpop.f32.mrb[41].mxu1 }
 0x3a3   : > { %4673 = vst [vmem:[#allocation18_spill] sm:$0xff] %v3445_v50  ;;  %v1876_v52 = vmax.f32 %v1874_v36, %v3445_v50  ;;  %v3448_v54 = vpop.f32.mrb[42].mxu1  ;;  %vm1693_vm5 = vcmp.eq.s32.totalorder %v1313_v55, 0 }
 0x3a4   : > { %v1840_v56 = vmax.f32 %v1838_v40, %v3448_v54  ;;  %v3451_v58 = vpop.f32.mrb[43].mxu1 }
 0x3a5   : > { %4674 = vst [vmem:[#allocation19_spill] sm:$0xff] %v3451_v58  ;;  %v1877_v60 = vmax.f32 %v1875_v44, %v3451_v58 }
 0x3a9   : > { %v3454_v62 = vpop.f32.mrb[44].mxu1 }
 0x3aa   : > { %v1841_v1 = vmax.f32 %v1839_v48, %v3454_v62  ;;  %v3457_v3 = vpop.f32.mrb[45].mxu1 }
 0x3ab   : > { %4675 = vst [vmem:[#allocation20_spill] sm:$0xff] %v3457_v3  ;;  %v1878_v5 = vmax.f32 %v1876_v52, %v3457_v3  ;;  %v3460_v7 = vpop.f32.mrb[46].mxu1 }
 0x3ac   : > { %v1842_v9 = vmax.f32 %v1840_v56, %v3460_v7  ;;  %v3463_v0 = vpop.f32.mrb[47].mxu1  ;;  %v2797_v20 = vpop.permute.xlu0 %2796 }
 0x3ad   : > { %4676 = vst [vmem:[#allocation21_spill] sm:$0xff] %v3463_v0  ;;  %v1879_v24 = vmax.f32 %v1877_v60, %v3463_v0  ;;  %v2799_v28 = vunpack.i.h.bf16 %v2797_v20  ;;  %v2798_v32 = vunpack.i.l.bf16 %v2797_v20 }
 0x3af   : > { %v501_v36 = vsel %vm499_vm2, %v2798_v32, %v2799_v28  ;;  %v509_v40 = vsel %vm499_vm2, %v2799_v28, %v2798_v32 }
 0x3b0   : > { %v513_v44 = vmax.f32 %v3314_v11, %v509_v40  ;;  %v512_v48 = vmax.f32 %v3312_v10, %v501_v36  ;;  %v2802_v11 = vld [vmem:[%s4587_s5] sm:$0xff]  }
 0x3b1   : > { %v3470_v52 = vpop.f32.mrb[48].mxu1 }
 0x3b2   : > { %v1843_v3 = vmax.f32 %v1841_v1, %v3470_v52  ;;  %v3473_v56 = vpop.f32.mrb[49].mxu1  ;;  %v517_v58 = vpack.c.bf16 %v513_v44, %v513_v44  ;;  %v516_v50 = vpack.c.bf16 %v512_v48, %v512_v48 }
 0x3b3   : > { %4677 = vst [vmem:[#allocation22_spill] sm:$0xff] %v3473_v56  ;;  %v1880_v60 = vmax.f32 %v1878_v5, %v3473_v56  ;;  %v3476_v0 = vpop.f32.mrb[50].mxu1 }
 0x3b4   : > { %v1844_v20 = vmax.f32 %v1842_v9, %v3476_v0  ;;  %2675 = vmatprep.subr.msk.bf16.mxu0 %vm529_vm3, %v517_v58  ;;  %v3480_v28 = vpop.f32.mrb[51].mxu1  ;;  %v531_v10 = vsel %vm529_vm3, %v516_v50, 0 }
 0x3b5   : > { %4678 = vst [vmem:[#allocation23_spill] sm:$0xff] %v3480_v28  ;;  %v1881_v1 = vmax.f32 %v1879_v24, %v3480_v28  ;;  %537 = vmatpush1.bf16.msra.mxu0 %v531_v10 }
 0x3b8   : > { %2676 = vmatmul.mubr.msk.bf16.vlgmr.msra.gmra.mrb[8].mxu0 %vm525_vm4, %v2802_v11 }
 0x3b9   : > { %v3488_v5 = vpop.f32.mrb[52].mxu1 }
 0x3ba   : > { %v1845_v32 = vmax.f32 %v1843_v3, %v3488_v5  ;;  %v3491_v9 = vpop.f32.mrb[53].mxu1 }
 0x3bb   : > { %4679 = vst [vmem:[#allocation24_spill] sm:$0xff] %v3491_v9  ;;  %v1882_v58 = vmax.f32 %v1880_v60, %v3491_v9  ;;  %v3494_v36 = vpop.f32.mrb[54].mxu1 }
 0x3bc   : > { %v1846_v50 = vmax.f32 %v1844_v20, %v3494_v36  ;;  %v3497_v40 = vpop.f32.mrb[55].mxu1 }
 0x3bd   : > { %4680 = vst [vmem:[#allocation25_spill] sm:$0xff] %v3497_v40  ;;  %v1883_v44 = vmax.f32 %v1881_v1, %v3497_v40 }
 0x3c1   : > { %v3500_v24 = vpop.f32.mrb[56].mxu1 }
 0x3c2   : > { %4681 = vst [vmem:[#allocation26_spill] sm:$0xff] %v3500_v24  ;;  %v1847_v48 = vmax.f32 %v1845_v32, %v3500_v24  ;;  %v3503_v10 = vpop.f32.mrb[57].mxu1 }
 0x3c3   : > { %4682 = vst [vmem:[#allocation27_spill] sm:$0xff] %v3503_v10  ;;  %v1884_v3 = vmax.f32 %v1882_v58, %v3503_v10  ;;  %v3506_v11 = vpop.f32.mrb[58].mxu1 }
 0x3c4   : > { %4683 = vst [vmem:[#allocation28_spill] sm:$0xff] %v3506_v11  ;;  %v1848_v60 = vmax.f32 %v1846_v50, %v3506_v11  ;;  %v3509_v9 = vpop.f32.mrb[59].mxu1  ;;  %v1397_v11 = vand.u32 1, %v873_v42 }
 0x3c5   : > { %4684 = vst [vmem:[#allocation29_spill] sm:$0xff] %v3509_v9  ;;  %v1885_v20 = vmax.f32 %v1883_v44, %v3509_v9 }
 0x3c6   : > { %vm1705_vm11 = vcmp.eq.s32.totalorder %v1397_v11, 0 }
 0x3c9   : > { %v3512_v28 = vpop.f32.mrb[60].mxu1 }
 0x3ca   : > { %v1849_v1 = vmax.f32 %v1847_v48, %v3512_v28  ;;  %v3515_v40 = vpop.f32.mrb[61].mxu1 }
 0x3cb   : > { %4685 = vst [vmem:[#allocation30_spill] sm:$0xff] %v3515_v40  ;;  %v1886_v32 = vmax.f32 %v1884_v3, %v3515_v40  ;;  %v3518_v56 = vpop.f32.mrb[62].mxu1  ;;  %v862_v3 = vadd.s32 8, %v3524_v18 }
 0x3cc   : > { %4686 = vst [vmem:[#allocation31_spill] sm:$0xff] %v3518_v56  ;;  %v1850_v58 = vmax.f32 %v1848_v60, %v3518_v56  ;;  %v3521_v10 = vpop.f32.mrb[63].mxu1 }
 0x3cd   : > { %4687 = vst [vmem:[#allocation32_spill] sm:$0xff] %v3521_v10  ;;  %v1887_v50 = vmax.f32 %v1885_v20, %v3521_v10  ;;  %v1320_v20 = vand.u32 1, %v862_v3 }
 0x3ce   : > { %v1851_v34 = vmax.f32 %v1849_v1, %v1850_v58  ;;  %v865_v1 = vadd.s32 32, %v3524_v18 }
 0x3cf   : > { %v1888_v26 = vmax.f32 %v1886_v32, %v1887_v50  ;;  %v866_v32 = vadd.s32 40, %v3524_v18  ;;  %vm1694_vm6 = vcmp.eq.s32.totalorder %v1320_v20, 0 }
 0x3d0   : > { %v1852_v44 = vrot.slane %v1851_v34, 4 }
 0x3d1   : > { %v1889_v9 = vrot.slane %v1888_v26, 4 }
 0x3d2   : > { %v1853_v48 = vmax.f32 %v1851_v34, %v1852_v44  ;;  %v869_v34 = vadd.s32 64, %v3524_v18 }
 0x3d3   : > { %v1890_v8 = vmax.f32 %v1888_v26, %v1889_v9  ;;  %v870_v26 = vadd.s32 72, %v3524_v18 }
 0x3d4   : > { %v1854_v4 = vrot.slane %v1853_v48, 2  ;;  %v1369_v24 = vand.u32 1, %v869_v34  ;;  %v4636_v34 = vmov 0.0  }
 0x3d5   : > { %v1891_v63 = vrot.slane %v1890_v8, 2  ;;  %v3610_v42 = vsel %vm1694_vm6, 1.0, %v4636_v34 }
 0x3d6   : > { %v1855_v40 = vmax.f32 %v1853_v48, %v1854_v4  ;;  %vm1701_vm9 = vcmp.eq.s32.totalorder %v1369_v24, 0 }
 0x3d7   : > { %v1892_v59 = vmax.f32 %v1890_v8, %v1891_v63  ;;  %v3619_v24 = vsel %vm1701_vm9, 1.0, %v4636_v34 }
 0x3d8   : > { %v1856_v60 = vrot.slane %v1855_v40, 1 }
 0x3d9   : > { %v1893_v51 = vrot.slane %v1892_v59, 1 }
 0x3da   : > { %v3530_v58 = vmax.f32 %v1855_v40, %v1856_v60 }
 0x3db   : > { %v3535_v9 = vmax.f32 %v1892_v59, %v1893_v51 }
 0x3dc   : > { %v1895_v63 = vsub.f32 %v3322_v13, %v3530_v58  ;;  %v1897_v4 = vsub.f32 %v3326_v15, %v3530_v58  ;;  %v1899_v8 = vsub.f32 %v3330_v17, %v3530_v58  ;;  %v1901_v40 = vsub.f32 %v3338_v21, %v3530_v58 }
 0x3dd   : > { %v1903_v50 = vsub.f32 %v3346_v25, %v3530_v58  ;;  %v1905_v44 = vsub.f32 %v3352_v29, %v3530_v58  ;;  %v1907_v51 = vsub.f32 %v3358_v33, %v3530_v58  ;;  %v1909_v13 = vsub.f32 %v3364_v37, %v3530_v58 }
 0x3de   : > { %v1911_v15 = vsub.f32 %v3370_v41, %v3530_v58  ;;  %v1959_v29 = vmul.f32 1.442695, %v1895_v63  ;;  %v1963_v3 = vmul.f32 1.442695, %v1897_v4  ;;  %v1967_v25 = vmul.f32 1.442695, %v1899_v8 }
 0x3df   : > { %v1341_v21 = vand.u32 1, %v865_v1  ;;  %v1348_v33 = vand.u32 1, %v866_v32  ;;  %v1971_v17 = vmul.f32 1.442695, %v1901_v40  ;;  %v1376_v41 = vand.u32 1, %v870_v26 }
 0x3e0   : > { %2803 = vpow2.f32 %v1959_v29  ;;  %v1975_v59 = vmul.f32 1.442695, %v1903_v50  ;;  %v1979_v63 = vmul.f32 1.442695, %v1905_v44  ;;  %v874_v1 = vadd.s32 104, %v3524_v18  ;;  %v4703_v44 = vld [vmem:[#allocation15_spill] sm:$0xff] }
 0x3e1   : > { %2805 = vpow2.f32 %v1963_v3  ;;  %vm1697_vm7 = vcmp.eq.s32.totalorder %v1341_v21, 0  ;;  %vm1698_vm8 = vcmp.eq.s32.totalorder %v1348_v33, 0  ;;  %vm1702_vm10 = vcmp.eq.s32.totalorder %v1376_v41, 0  ;;  %v4692_v33 = vld [vmem:[#allocation9_spill] sm:$0xff] }
 0x3e2   : > { %2807 = vpow2.f32 %v1967_v25  ;;  %v1983_v32 = vmul.f32 1.442695, %v1907_v51  ;;  %v3607_v26 = vsel %vm1693_vm5, 1.0, %v4636_v34  ;;  %v3613_v55 = vsel %vm1697_vm7, 1.0, %v4636_v34 }
 0x3e3   : > { %2809 = vpow2.f32 %v1971_v17  ;;  %v3616_v20 = vsel %vm1698_vm8, 1.0, %v4636_v34  ;;  %v3622_v11 = vsel %vm1702_vm10, 1.0, %v4636_v34  ;;  %v1987_v4 = vmul.f32 1.442695, %v1909_v13  ;;  %v4697_v17 = vld [vmem:[#allocation11_spill] sm:$0xff] }
 0x3e4   : > { %2811 = vpow2.f32 %v1975_v59  ;;  %v1404_v8 = vand.u32 1, %v874_v1  ;;  %v3625_v40 = vsel %vm1705_vm11, 1.0, %v4636_v34  ;;  %v1991_v50 = vmul.f32 1.442695, %v1911_v15  ;;  %v4725_v34 = vld [vmem:[#allocation29_spill] sm:$0xff] }
 0x3e5   : > { %2813 = vpow2.f32 %v1979_v63  ;;  %v4688_v13 = vsub.f32 %v3376_v45, %v3530_v58  ;;  %v4690_v45 = vld [vmem:[#allocation8_spill] sm:$0xff]  ;;  %v4696_v1 = vsub.f32 %v3382_v49, %v3530_v58  ;;  %v878_v41 = vadd.s32 136, %v3524_v18 }
 0x3e6   : > { %2815 = vpow2.f32 %v1983_v32  ;;  %vm3659_vm12 = vcmp.eq.s32.totalorder %v1404_v8, 0  ;;  %v4701_v49 = vsub.f32 %v3388_v53, %v3530_v58  ;;  %v4706_v53 = vsub.f32 %v3394_v57, %v3530_v58 }
 0x3e7   : > { %v1995_v29 = vmul.f32 1.442695, %v4688_v13  ;;  %2817 = vpow2.f32 %v1987_v4  ;;  %v877_v13 = vadd.s32 128, %v3524_v18  ;;  %v4693_v4 = vld [vmem:[#allocation10_spill] sm:$0xff]  ;;  %v1999_v63 = vmul.f32 1.442695, %v4696_v1 }
 0x3e8   : > { %2819 = vpow2.f32 %v1991_v50  ;;  %v2003_v1 = vmul.f32 1.442695, %v4701_v49  ;;  %v4711_v57 = vsub.f32 %v3400_v61, %v3530_v58  ;;  %v4732_v56 = vsub.f32 %v3430_v30, %v3530_v58 }
 0x3e9   : > { %2821 = vpow2.f32 %v1995_v29  ;;  %v2007_v29 = vmul.f32 1.442695, %v4706_v53  ;;  %v4734_v30 = vsub.f32 %v3328_v16, %v3535_v9  ;;  %v4738_v16 = vsub.f32 %v3436_v38, %v3530_v58 }
 0x3ea   : > { %v2804_v25 = vpop.eup %2803  ;;  %2823 = vpow2.f32 %v1999_v63  ;;  %v2011_v53 = vmul.f32 1.442695, %v4711_v57  ;;  %v4718_v57 = vsub.f32 %v3406_v2, %v3530_v58  ;;  %v4723_v2 = vsub.f32 %v3412_v6, %v3530_v58 }
 0x3eb   : > { %v2806_v59 = vpop.eup %2805  ;;  %v3645_v3 = vmul.f32 %v2804_v25, %v3607_v26  ;;  %2825 = vpow2.f32 %v2003_v1  ;;  %v4726_v1 = vmov 0.0   ;;  %vm2422_vm5 = vcmask 23552  }
 0x3ec   : > { %v2808_v32 = vpop.eup %2807  ;;  %v3653_v48 = vmul.f32 %v2806_v59, %v3610_v42  ;;  %v4708_v59 = vld [vmem:[#allocation18_spill] sm:$0xff]  ;;  %2827 = vpow2.f32 %v2007_v29  ;;  %v2015_v49 = vmul.f32 1.442695, %v4718_v57  ;;  %v2019_v57 = vmul.f32 1.442695, %v4723_v2 }
 0x3ed   : > { %4689 = vst [vmem:[#allocation33_spill] sm:$0xff] %v3645_v3  ;;  %v2810_v25 = vpop.eup %2809  ;;  %v3671_v37 = vmul.f32 0.0, %v2808_v32  ;;  %v1425_v32 = vand.u32 1, %v877_v13  ;;  %v1432_v13 = vand.u32 1, %v878_v41  ;;  %2829 = vpow2.f32 %v2011_v53 }
 0x3ee   : > { %4691 = vst [vmem:[#allocation8_spill] sm:$0xff] %v3653_v48  ;;  %v2151_v8 = vadd.f32 %v3653_v48, %v3645_v3  ;;  %v2812_v60 = vpop.eup %2811  ;;  %v3684_v51 = vmul.f32 0.0, %v2810_v25  ;;  %v4705_v3 = vld [vmem:[#allocation16_spill] sm:$0xff]  ;;  %2831 = vpow2.f32 %v2015_v49  ;;  %v4729_v2 = vsub.f32 %v3418_v12, %v3530_v58 }
 0x3ef   : > { %4699 = vst [vmem:[#allocation9_spill] sm:$0xff] %v3671_v37  ;;  %v2814_v15 = vpop.eup %2813  ;;  %v3697_v25 = vmul.f32 %v2812_v60, %v3613_v55  ;;  %vm3709_vm13 = vcmp.eq.s32.totalorder %v1425_v32, 0  ;;  %v4724_v32 = vld [vmem:[#allocation27_spill] sm:$0xff]  ;;  %vm1710_vm14 = vcmp.eq.s32.totalorder %v1432_v13, 0  ;;  %v882_v12 = vadd.s32 168, %v3524_v18 }
 0x3f0   : > { %4704 = vst [vmem:[#allocation10_spill] sm:$0xff] %v3684_v51  ;;  %v2152_v48 = vadd.f32 %v2151_v8, %v3671_v37  ;;  %v2816_v63 = vpop.eup %2815  ;;  %v2023_v41 = vmul.f32 1.442695, %v4729_v2  ;;  %v3757_v21 = vsel %vm3709_vm13, 1.0, %v4726_v1  ;;  %2833 = vpow2.f32 %v2019_v57 }
 0x3f1   : > { %4709 = vst [vmem:[#allocation11_spill] sm:$0xff] %v3697_v25  ;;  %v2818_v61 = vpop.eup %2817  ;;  %v3727_v50 = vmul.f32 0.0, %v2816_v63  ;;  %v3742_v63 = vsel %vm3659_vm12, 1.0, %v4726_v1  ;;  %v2031_v60 = vmul.f32 1.442695, %v4732_v56  ;;  %v886_v57 = vadd.s32 200, %v3524_v18 }
 0x3f2   : > { %v2153_v8 = vadd.f32 %v2152_v48, %v3684_v51  ;;  %v3714_v48 = vmul.f32 %v2814_v15, %v3616_v20  ;;  %v881_v15 = vadd.s32 160, %v3524_v18  ;;  %v4722_v51 = vld [vmem:[#allocation25_spill] sm:$0xff]  ;;  %v2820_v29 = vpop.eup %2819  ;;  %2835 = vpow2.f32 %v2023_v41 }
 0x3f3   : > { %4721 = vst [vmem:[#allocation16_spill] sm:$0xff] %v3727_v50  ;;  %v2822_v6 = vpop.eup %2821  ;;  %v1965_v56 = vmul.f32 1.442695, %v4734_v30  ;;  %v2035_v41 = vmul.f32 1.442695, %v4738_v16 }
 0x3f4   : > { %4716 = vst [vmem:[#allocation15_spill] sm:$0xff] %v3714_v48  ;;  %v2154_v37 = vadd.f32 %v2153_v8, %v3697_v25  ;;  %v2824_v13 = vpop.eup %2823  ;;  %v1453_v2 = vand.u32 1, %v881_v15  ;;  %v885_v15 = vadd.s32 192, %v3524_v18 }
 0x3f5   : > { %v3785_v10 = vmul.f32 0.0, %v2824_v13 }
 0x3f6   : > { %v2155_v8 = vadd.f32 %v2154_v37, %v3714_v48  ;;  %v3744_v37 = vmul.f32 0.0, %v2818_v61  ;;  %v4730_v61 = vsub.f32 %v3424_v22, %v3530_v58  ;;  %v3763_v48 = vmul.f32 %v2820_v29, %v3619_v24 }
 0x3f7   : > { %v3774_v22 = vmul.f32 %v2822_v6, %v3622_v11  ;;  %vm3791_vm15 = vcmp.eq.s32.totalorder %v1453_v2, 0  ;;  %v1488_v2 = vand.u32 1, %v886_v57 }
 0x3f8   : > { %4727 = vst [vmem:[#allocation18_spill] sm:$0xff] %v3744_v37  ;;  %v2156_v25 = vadd.f32 %v2155_v8, %v3727_v50  ;;  %v2027_v8 = vmul.f32 1.442695, %v4730_v61  ;;  %4731 = vst [vmem:[#allocation25_spill] sm:$0xff] %v3763_v48  ;;  %v3771_v50 = vsel %vm1710_vm14, 1.0, %v4726_v1 }
 0x3f9   : > { %vm3837_vm2 = vcmp.eq.s32.totalorder %v1488_v2, 0 }
 0x3fa   : > { %v2157_v49 = vadd.f32 %v2156_v25, %v3744_v37  ;;  %v4733_v25 = vsub.f32 %v3324_v14, %v3535_v9  ;;  %v2826_v37 = vpop.eup %2825  ;;  %2837 = vpow2.f32 %v2027_v8 }
 0x3fb   : > { %2839 = vpow2.f32 %v2031_v60  ;;  %v3798_v8 = vmul.f32 0.0, %v2826_v37 }
 0x3fc   : > { %v2158_v29 = vadd.f32 %v2157_v49, %v3763_v48  ;;  %v1961_v61 = vmul.f32 1.442695, %v4733_v25  ;;  %v4735_v49 = vsub.f32 %v3334_v19, %v3535_v9  ;;  %v2828_v25 = vpop.eup %2827  ;;  %v1460_v48 = vand.u32 1, %v882_v12 }
 0x3fd   : > { %4739 = vst [vmem:[#allocation27_spill] sm:$0xff] %v3798_v8  ;;  %v4740_v19 = vsub.f32 %v3342_v23, %v3535_v9  ;;  %v2830_v30 = vpop.eup %2829  ;;  %v1481_v12 = vand.u32 1, %v885_v15  ;;  %v3808_v38 = vmul.f32 %v2828_v25, %v3625_v40  ;;  %v4746_v15 = vsub.f32 %v3448_v54, %v3530_v58 }
 0x3fe   : > { %v2159_v6 = vadd.f32 %v2158_v29, %v3774_v22  ;;  %v1969_v14 = vmul.f32 1.442695, %v4735_v49  ;;  %2841 = vpow2.f32 %v1961_v61  ;;  %v4741_v49 = vsub.f32 %v3442_v46, %v3530_v58  ;;  %v2832_v23 = vpop.eup %2831 }
 0x3ff   : > { %v1973_v29 = vmul.f32 1.442695, %v4740_v19  ;;  %2843 = vpow2.f32 %v1965_v56  ;;  %4742 = vst [vmem:[#allocation29_spill] sm:$0xff] %v3808_v38  ;;  %v4743_v61 = vsub.f32 %v3349_v27, %v3535_v9  ;;  %vm3814_vm0 = vcmp.eq.s32.totalorder %v1460_v48, 0  ;;  %v2834_v25 = vpop.eup %2833 }
 0x400   : > { %v2160_v13 = vadd.f32 %v2159_v6, %v3785_v10  ;;  %v2039_v60 = vmul.f32 1.442695, %v4741_v49  ;;  %2845 = vpow2.f32 %v1969_v14  ;;  %v3821_v46 = vsel %vm3791_vm15, 1.0, %v4726_v1 }
 0x401   : > { %v1977_v6 = vmul.f32 1.442695, %v4743_v61  ;;  %2847 = vpow2.f32 %v2035_v41  ;;  %v2043_v57 = vmul.f32 1.442695, %v4746_v15  ;;  %v3827_v56 = vmul.f32 %v2830_v30, %v3742_v63 }
 0x402   : > { %v2161_v37 = vadd.f32 %v2160_v13, %v3798_v8  ;;  %2849 = vpow2.f32 %v1973_v29  ;;  %v4748_v48 = vsub.f32 %v3355_v31, %v3535_v9  ;;  %vm3833_vm1 = vcmp.eq.s32.totalorder %v1481_v12, 0  ;;  %v2836_v12 = vpop.eup %2835 }
 0x403   : > { %4747 = vst [vmem:[#allocation34_spill] sm:$0xff] %v3827_v56  ;;  %2851 = vpow2.f32 %v2039_v60  ;;  %v4753_v54 = vsub.f32 %v3454_v62, %v3530_v58  ;;  %v3844_v19 = vmul.f32 0.0, %v2832_v23  ;;  %v4754_v31 = vsub.f32 %v3361_v35, %v3535_v9 }
 0x404   : > { %v2162_v27 = vadd.f32 %v2161_v37, %v3808_v38  ;;  %v1981_v14 = vmul.f32 1.442695, %v4748_v48  ;;  %2853 = vpow2.f32 %v1977_v6  ;;  %v3853_v2 = vsel %vm3814_vm0, 1.0, %v4726_v1  ;;  %v2838_v37 = vpop.eup %2837 }
 0x405   : > { %v2047_v13 = vmul.f32 1.442695, %v4753_v54  ;;  %v1985_v30 = vmul.f32 1.442695, %v4754_v31  ;;  %v3856_v49 = vadd.s32 224, %v3524_v18  ;;  %2855 = vpow2.f32 %v2043_v57  ;;  %v2840_v16 = vpop.eup %2839 }
 0x406   : > { %v2163_v29 = vadd.f32 %v2162_v27, %v3827_v56  ;;  %v4755_v62 = vsub.f32 %v3460_v7, %v3530_v58  ;;  %v3861_v61 = vmul.f32 0.0, %v2834_v25  ;;  %2857 = vpow2.f32 %v1981_v14 }
 0x407   : > { %v4756_v6 = vsub.f32 %v3367_v39, %v3535_v9  ;;  %v3870_v15 = vsel %vm3833_vm1, 1.0, %v4726_v1  ;;  %v3875_v7 = vsel %vm3837_vm2, 1.0, %v4726_v1  ;;  %2859 = vpow2.f32 %v2047_v13 }
 0x408   : > { %v2051_v60 = vmul.f32 1.442695, %v4755_v62  ;;  %v2164_v35 = vadd.f32 %v2163_v29, %v3844_v19  ;;  %v4757_v57 = vsub.f32 %v3470_v52, %v3530_v58  ;;  %v2842_v48 = vpop.eup %2841  ;;  %v3881_v39 = vmul.f32 %v2836_v12, %v3757_v21 }
 0x409   : > { %v1989_v23 = vmul.f32 1.442695, %v4756_v6  ;;  %2861 = vpow2.f32 %v1985_v30  ;;  %v4758_v25 = vsub.f32 %v3373_v43, %v3535_v9  ;;  %v2844_v54 = vpop.eup %2843  ;;  %v3888_v41 = vadd.s32 232, %v3524_v18 }
 0x40a   : > { %v2055_v27 = vmul.f32 1.442695, %v4757_v57  ;;  %v2165_v14 = vadd.f32 %v2164_v35, %v3861_v61  ;;  %v1509_v13 = vand.u32 1, %v3856_v49  ;;  %2863 = vpow2.f32 %v2051_v60  ;;  %v2846_v31 = vpop.eup %2845 }
 0x40b   : > { %v1993_v53 = vmul.f32 1.442695, %v4758_v25  ;;  %v4759_v52 = vsub.f32 %v3476_v0, %v3530_v58  ;;  %v3895_v12 = vmul.f32 %v2838_v37, %v3771_v50  ;;  %2865 = vpow2.f32 %v1989_v23  ;;  %v2848_v18 = vpop.eup %2847 }
 0x40c   : > { %v2166_v30 = vadd.f32 %v2165_v14, %v3881_v39  ;;  %v4760_v43 = vsub.f32 %v3379_v47, %v3535_v9  ;;  %2867 = vpow2.f32 %v2055_v27  ;;  %v4761_v60 = vsub.f32 %v3488_v5, %v3530_v58  ;;  %v2850_v37 = vpop.eup %2849 }
 0x40d   : > { %v2059_v29 = vmul.f32 1.442695, %v4759_v52  ;;  %v3905_v0 = vmul.f32 %v2842_v48, %v3607_v26  ;;  %v3908_v6 = vmul.f32 %v2844_v54, %v3610_v42  ;;  %v3910_v57 = vmul.f32 0.0, %v2840_v16  ;;  %v2852_v14 = vpop.eup %2851 }
 0x40e   : > { %v1997_v62 = vmul.f32 1.442695, %v4760_v43  ;;  %v2063_v35 = vmul.f32 1.442695, %v4761_v60  ;;  %v2167_v23 = vadd.f32 %v2166_v30, %v3895_v12  ;;  %2869 = vpow2.f32 %v1993_v53  ;;  %v2854_v16 = vpop.eup %2853 }
 0x40f   : > { %v4762_v47 = vsub.f32 %v4690_v45, %v3535_v9  ;;  %2871 = vpow2.f32 %v2059_v29  ;;  %v4763_v5 = vsub.f32 %v3494_v36, %v3530_v58  ;;  %v3919_v48 = vmul.f32 0.0, %v2846_v31  ;;  %v2856_v52 = vpop.eup %2855  ;;  %v4765_v29 = vld [vmem:[#allocation26_spill] sm:$0xff] }
 0x410   : > { %v2188_v42 = vadd.f32 %v3908_v6, %v3905_v0  ;;  %v3923_v25 = vmul.f32 0.0, %v2848_v18  ;;  %v2168_v53 = vadd.f32 %v2167_v23, %v3910_v57  ;;  %2873 = vpow2.f32 %v1997_v62  ;;  %v2858_v60 = vpop.eup %2857 }
 0x411   : > { %v2001_v27 = vmul.f32 1.442695, %v4762_v47  ;;  %v2067_v26 = vmul.f32 1.442695, %v4763_v5  ;;  %v4764_v45 = vsub.f32 %v4692_v33, %v3535_v9  ;;  %2875 = vpow2.f32 %v2063_v35  ;;  %v2860_v35 = vpop.eup %2859  ;;  %v4768_v47 = vld [vmem:[#allocation28_spill] sm:$0xff] }
 0x412   : > { %v4766_v36 = vsub.f32 %v4765_v29, %v3530_v58  ;;  %v3932_v30 = vmul.f32 0.0, %v2850_v37  ;;  %v2189_v43 = vadd.f32 %v2188_v42, %v3919_v48  ;;  %v3936_v18 = vmul.f32 %v2852_v14, %v3821_v46 }
 0x413   : > { %v2005_v54 = vmul.f32 1.442695, %v4764_v45  ;;  %v2169_v62 = vadd.f32 %v2168_v53, %v3923_v25  ;;  %2877 = vpow2.f32 %v2001_v27  ;;  %v4767_v33 = vsub.f32 %v4693_v4, %v3535_v9  ;;  %v2862_v14 = vpop.eup %2861 }
 0x414   : > { %v2071_v31 = vmul.f32 1.442695, %v4766_v36  ;;  %2879 = vpow2.f32 %v2067_v26  ;;  %v4769_v5 = vsub.f32 %v4768_v47, %v3530_v58  ;;  %v3946_v45 = vmul.f32 %v2854_v16, %v3613_v55  ;;  %v2864_v53 = vpop.eup %2863 }
 0x415   : > { %v2009_v23 = vmul.f32 1.442695, %v4767_v33  ;;  %v2190_v42 = vadd.f32 %v2189_v43, %v3932_v30  ;;  %v3950_v29 = vmul.f32 %v2856_v52, %v3853_v2  ;;  %v2170_v27 = vadd.f32 %v2169_v62, %v3936_v18  ;;  %v2866_v52 = vpop.eup %2865  ;;  %v4772_v62 = vld [vmem:[#allocation12_spill] sm:$0xff] }
 0x416   : > { %v2075_v37 = vmul.f32 1.442695, %v4769_v5  ;;  %2881 = vpow2.f32 %v2005_v54  ;;  %v4770_v4 = vsub.f32 %v4697_v17, %v3535_v9  ;;  %v4771_v36 = vsub.f32 %v3512_v28, %v3530_v58  ;;  %v4774_v5 = vld [vmem:[#allocation31_spill] sm:$0xff] }
 0x417   : > { %2883 = vpow2.f32 %v2071_v31  ;;  %v3960_v16 = vmul.f32 %v2858_v60, %v3616_v20  ;;  %v2191_v43 = vadd.f32 %v2190_v42, %v3946_v45  ;;  %v3963_v33 = vmul.f32 0.0, %v2860_v35  ;;  %v2868_v31 = vpop.eup %2867 }
 0x418   : > { %v2013_v26 = vmul.f32 1.442695, %v4770_v4  ;;  %v2079_v55 = vmul.f32 1.442695, %v4771_v36  ;;  %v2171_v54 = vadd.f32 %v2170_v27, %v3950_v29  ;;  %2885 = vpow2.f32 %v2009_v23  ;;  %v2870_v42 = vpop.eup %2869  ;;  %v4776_v23 = vld [vmem:[#allocation13_spill] sm:$0xff] }
 0x419   : > { %v4773_v17 = vsub.f32 %v4772_v62, %v3535_v9  ;;  %2887 = vpow2.f32 %v2075_v37  ;;  %v4775_v28 = vsub.f32 %v4774_v5, %v3530_v58  ;;  %v3972_v20 = vmul.f32 0.0, %v2862_v14 }
 0x41a   : > { %v2192_v60 = vadd.f32 %v2191_v43, %v3960_v16  ;;  %v3975_v35 = vmul.f32 0.0, %v2864_v53  ;;  %v2172_v27 = vadd.f32 %v2171_v54, %v3963_v33  ;;  %2889 = vpow2.f32 %v2013_v26  ;;  %v4778_v26 = vld [vmem:[#allocation14_spill] sm:$0xff] }
 0x41b   : > { %v2017_v47 = vmul.f32 1.442695, %v4773_v17  ;;  %v2083_v4 = vmul.f32 1.442695, %v4775_v28  ;;  %v4777_v36 = vsub.f32 %v4776_v23, %v3535_v9  ;;  %v2872_v17 = vpop.eup %2871  ;;  %v1516_v37 = vand.u32 1, %v3888_v41 }
 0x41c   : > { %2891 = vpow2.f32 %v2079_v55  ;;  %v3982_v58 = vmul.f32 0.0, %v2866_v52  ;;  %v2193_v14 = vadd.f32 %v2192_v60, %v3972_v20  ;;  %v2874_v5 = vpop.eup %2873  ;;  %v3986_v43 = vmul.f32 %v2868_v31, %v3870_v15 }
 0x41d   : > { %v2021_v62 = vmul.f32 1.442695, %v4777_v36  ;;  %v2173_v53 = vadd.f32 %v2172_v27, %v3975_v35  ;;  %2893 = vpow2.f32 %v2017_v47  ;;  %v4779_v54 = vsub.f32 %v4778_v26, %v3535_v9  ;;  %v2876_v23 = vpop.eup %2875 }
 0x41e   : > { %vm3994_vm3 = vcmp.eq.s32.totalorder %v1509_v13, 0  ;;  %2895 = vpow2.f32 %v2083_v4  ;;  %v3999_v55 = vmul.f32 %v2870_v42, %v3619_v24  ;;  %v2194_v52 = vadd.f32 %v2193_v14, %v3982_v58  ;;  %v2878_v31 = vpop.eup %2877 }
 0x41f   : > { %v2025_v28 = vmul.f32 1.442695, %v4779_v54  ;;  %v4003_v47 = vmul.f32 %v2872_v17, %v3875_v7  ;;  %v2174_v60 = vadd.f32 %v2173_v53, %v3986_v43  ;;  %2897 = vpow2.f32 %v2021_v62  ;;  %v2880_v27 = vpop.eup %2879 }
 0x420   : > { %v4782_v49 = vsub.f32 %v4703_v44, %v3535_v9  ;;  %vm4009_vm4 = vcmp.eq.s32.totalorder %v1516_v37, 0  ;;  %v4014_v24 = vmul.f32 %v2874_v5, %v3622_v11  ;;  %v2195_v4 = vadd.f32 %v2194_v52, %v3999_v55  ;;  %v2882_v42 = vpop.eup %2881 }
 0x421   : > { %v4017_v17 = vmul.f32 0.0, %v2876_v23  ;;  %v2175_v14 = vadd.f32 %v2174_v60, %v4003_v47  ;;  %2899 = vpow2.f32 %v2025_v28  ;;  %v4785_v44 = vsub.f32 %v4705_v3, %v3535_v9  ;;  %v2884_v53 = vpop.eup %2883  ;;  %v4786_v28 = vld [vmem:[#allocation17_spill] sm:$0xff] }
 0x422   : > { %v2029_v13 = vmul.f32 1.442695, %v4782_v49  ;;  %v4026_v37 = vsel %vm3994_vm3, 1.0, %v4726_v1  ;;  %v4028_v11 = vmul.f32 0.0, %v2878_v31  ;;  %v2196_v5 = vadd.f32 %v2195_v4, %v4014_v24  ;;  %v2886_v26 = vpop.eup %2885 }
 0x423   : > { %v2033_v62 = vmul.f32 1.442695, %v4785_v44  ;;  %v4031_v54 = vmul.f32 0.0, %v2880_v27  ;;  %v2176_v23 = vadd.f32 %v2175_v14, %v4017_v17  ;;  %v4787_v3 = vsub.f32 %v4786_v28, %v3535_v9  ;;  %v2888_v60 = vpop.eup %2887 }
 0x424   : > { %2901 = vpow2.f32 %v2029_v13  ;;  %v4040_v41 = vsel %vm4009_vm4, 1.0, %v4726_v1  ;;  %v4042_v31 = vmul.f32 0.0, %v2882_v42  ;;  %v2197_v49 = vadd.f32 %v2196_v5, %v4028_v11  ;;  %v2890_v4 = vpop.eup %2889 }
 0x425   : > { %v2037_v52 = vmul.f32 1.442695, %v4787_v3  ;;  %v4046_v27 = vmul.f32 %v2884_v53, %v4026_v37  ;;  %v2177_v13 = vadd.f32 %v2176_v23, %v4031_v54  ;;  %2903 = vpow2.f32 %v2033_v62  ;;  %v4790_v3 = vld [vmem:[#allocation19_spill] sm:$0xff] }
 0x426   : > { %v4788_v14 = vsub.f32 %v4708_v59, %v3535_v9  ;;  %v2892_v28 = vpop.eup %2891  ;;  %v4053_v36 = vmul.f32 %v2886_v26, %v3625_v40  ;;  %v2198_v1 = vadd.f32 %v2197_v49, %v4042_v31  ;;  %v4057_v5 = vmul.f32 %v2888_v60, %v4040_v41  ;;  %v4793_v60 = vld [vmem:[#allocation20_spill] sm:$0xff] }
 0x427   : > { %v2894_v42 = vpop.eup %2893  ;;  %v2178_v53 = vadd.f32 %v2177_v13, %v4046_v27  ;;  %2905 = vpow2.f32 %v2037_v52  ;;  %v4791_v62 = vsub.f32 %v4790_v3, %v3535_v9  ;;  %v4064_v59 = vmul.f32 %v2890_v4, %v3742_v63  ;;  %v4796_v4 = vld [vmem:[#allocation21_spill] sm:$0xff] }
 0x428   : > { %v2041_v44 = vmul.f32 1.442695, %v4788_v14  ;;  %4789 = vst [vmem:[#allocation26_spill] sm:$0xff] %v4053_v36  ;;  %v2896_v56 = vpop.eup %2895  ;;  %v2199_v40 = vadd.f32 %v2198_v1, %v4053_v36  ;;  %v4067_v14 = vmul.f32 0.0, %v2892_v28  ;;  %v4794_v13 = vsub.f32 %v4793_v60, %v3535_v9 }
 0x429   : > { %v2045_v23 = vmul.f32 1.442695, %v4791_v62  ;;  %4792 = vst [vmem:[#allocation28_spill] sm:$0xff] %v4064_v59  ;;  %v2898_v26 = vpop.eup %2897  ;;  %v2179_v49 = vadd.f32 %v2178_v53, %v4057_v5  ;;  %v4073_v38 = vmul.f32 0.0, %v2894_v42  ;;  %v4076_v8 = vmul.f32 0.0, %v2896_v56 }
 0x42a   : > { %2907 = vpow2.f32 %v2041_v44  ;;  %v2049_v52 = vmul.f32 1.442695, %v4794_v13  ;;  %v2200_v3 = vadd.f32 %v2199_v40, %v4064_v59  ;;  %v4797_v28 = vsub.f32 %v4796_v4, %v3535_v9  ;;  %v4799_v13 = vld [vmem:[#allocation22_spill] sm:$0xff] }
 0x42b   : > { %4795 = vst [vmem:[#allocation12_spill] sm:$0xff] %v4073_v38  ;;  %v2900_v62 = vpop.eup %2899  ;;  %v2180_v63 = vadd.f32 %v2179_v49, %v4067_v14  ;;  %2909 = vpow2.f32 %v2045_v23  ;;  %v4082_v53 = vmul.f32 0.0, %v2898_v26  ;;  %v4800_v40 = vsub.f32 %v4799_v13, %v3535_v9  ;;  %v4801_v26 = vld [vmem:[#allocation23_spill] sm:$0xff] }
 0x42c   : > { %v2053_v1 = vmul.f32 1.442695, %v4797_v28  ;;  %v2201_v44 = vadd.f32 %v2200_v3, %v4073_v38  ;;  %2911 = vpow2.f32 %v2049_v52  ;;  %v4090_v59 = vmul.f32 %v2900_v62, %v3757_v21 }
 0x42d   : > { %4798 = vst [vmem:[#allocation31_spill] sm:$0xff] %v4082_v53  ;;  %v2181_v42 = vadd.f32 %v2180_v63, %v4076_v8  ;;  %v2057_v56 = vmul.f32 1.442695, %v4800_v40  ;;  %v4802_v28 = vsub.f32 %v4801_v26, %v3535_v9  ;;  %v4803_v40 = vld [vmem:[#allocation24_spill] sm:$0xff] }
 0x42e   : > { %v2902_v60 = vpop.eup %2901  ;;  %v2202_v23 = vadd.f32 %v2201_v44, %v4082_v53  ;;  %2913 = vpow2.f32 %v2053_v1  ;;  %v4804_v21 = vsub.f32 %v4803_v40, %v3535_v9 }
 0x42f   : > { %v2904_v49 = vpop.eup %2903  ;;  %v2182_v4 = vrot.slane %v2181_v42, 4  ;;  %v2061_v3 = vmul.f32 1.442695, %v4802_v28  ;;  %v4097_v38 = vmul.f32 %v2902_v60, %v3771_v50  ;;  %2915 = vpow2.f32 %v2057_v56 }
 0x430   : > { %v2203_v52 = vadd.f32 %v2202_v23, %v4090_v59  ;;  %v2065_v62 = vmul.f32 1.442695, %v4804_v21  ;;  %v4103_v44 = vmul.f32 0.0, %v2904_v49 }
 0x431   : > { %v2906_v63 = vpop.eup %2905  ;;  %v2183_v13 = vadd.f32 %v2182_v4, %v2181_v42  ;;  %2917 = vpow2.f32 %v2061_v3  ;;  %v4805_v42 = vsub.f32 %v4722_v51, %v3535_v9 }
 0x432   : > { %v2204_v1 = vadd.f32 %v2203_v52, %v4097_v38  ;;  %v4106_v26 = vmul.f32 0.0, %v2906_v63  ;;  %2919 = vpow2.f32 %v2065_v62  ;;  %v4807_v62 = vsub.f32 %v4725_v34, %v3535_v9 }
 0x433   : > { %v2184_v36 = vrot.slane %v2183_v13, 2  ;;  %v2069_v56 = vmul.f32 1.442695, %v4805_v42 }
 0x434   : > { %v2908_v53 = vpop.eup %2907  ;;  %v2205_v50 = vadd.f32 %v2204_v1, %v4103_v44 }
 0x435   : > { %v2910_v60 = vpop.eup %2909  ;;  %v2185_v23 = vadd.f32 %v2184_v36, %v2183_v13  ;;  %v4113_v4 = vmul.f32 %v2908_v53, %v3821_v46  ;;  %v4806_v36 = vsub.f32 %v4724_v32, %v3535_v9  ;;  %2921 = vpow2.f32 %v2069_v56  ;;  %v4810_v56 = vld [vmem:[#allocation32_spill] sm:$0xff] }
 0x436   : > { %v2206_v49 = vadd.f32 %v2205_v50, %v4106_v26  ;;  %v2912_v28 = vpop.eup %2911  ;;  %v4117_v3 = vmul.f32 %v2910_v60, %v3853_v2  ;;  %v2077_v2 = vmul.f32 1.442695, %v4807_v62 }
 0x437   : > { %v2186_v52 = vrot.slane %v2185_v23, 1  ;;  %v2073_v13 = vmul.f32 1.442695, %v4806_v36  ;;  %v4123_v51 = vmul.f32 0.0, %v2912_v28 }
 0x438   : > { %v2207_v63 = vadd.f32 %v2206_v49, %v4113_v4  ;;  %v2914_v40 = vpop.eup %2913  ;;  %v4811_v49 = vsub.f32 %v4810_v56, %v3535_v9 }
 0x439   : > { %v2187_v21 = vadd.f32 %v2186_v52, %v2185_v23  ;;  %v2916_v53 = vpop.eup %2915  ;;  %v4129_v1 = vmul.f32 0.0, %v2914_v40  ;;  %v4808_v23 = vld [vmem:[#allocation30_spill] sm:$0xff] }
 0x43a   : > { %v2208_v46 = vadd.f32 %v2207_v63, %v4117_v3  ;;  %v4809_v32 = vsub.f32 %v4808_v23, %v3535_v9  ;;  %v2085_v28 = vmul.f32 1.442695, %v4811_v49  ;;  %v4139_v52 = vmul.f32 %v2916_v53, %v3870_v15 }
 0x43b   : > { %2923 = vrcp.f32 %v2187_v21  ;;  %v2918_v60 = vpop.eup %2917 }
 0x43c   : > { %v2209_v50 = vadd.f32 %v2208_v46, %v4123_v51  ;;  %2925 = vpow2.f32 %v2073_v13  ;;  %v2081_v42 = vmul.f32 1.442695, %v4809_v32  ;;  %v2920_v63 = vpop.eup %2919  ;;  %v4143_v40 = vmul.f32 %v2918_v60, %v3875_v7 }
 0x43d   : > { %2927 = vpow2.f32 %v2077_v2  ;;  %v4146_v36 = vmul.f32 0.0, %v2920_v63 }
 0x43e   : > { %v2210_v34 = vadd.f32 %v2209_v50, %v4129_v1  ;;  %2929 = vpow2.f32 %v2081_v42 }
 0x43f   : > { %2931 = vpow2.f32 %v2085_v28  ;;  %v2922_v9 = vpop.eup %2921 }
 0x440   : > { %v2211_v21 = vadd.f32 %v2210_v34, %v4139_v52  ;;  %v4160_v2 = vmul.f32 0.0, %v2922_v9  ;;  %v4815_v9 = vld [vmem:[#allocation10_spill] sm:$0xff] }
 0x442   : > { %v2212_v13 = vadd.f32 %v2211_v21, %v4143_v40 }
 0x444   : > { %v2213_v46 = vadd.f32 %v2212_v13, %v4146_v36 }
 0x445   : > { %v4150_v15 = vpop.eup %2923 }
 0x446   : > { %v4154_v53 = vmul.f32 %v4150_v15, %v4076_v8  ;;  %v2926_v62 = vpop.eup %2925  ;;  %v4158_v7 = vmul.f32 %v4150_v15, %v3844_v19  ;;  %v4164_v50 = vmul.f32 %v4150_v15, %v3861_v61  ;;  %v4168_v60 = vmul.f32 %v4150_v15, %v3910_v57 }
 0x447   : > { %v4172_v23 = vmul.f32 %v4150_v15, %v3923_v25  ;;  %v4176_v8 = vmul.f32 %v4150_v15, %v3963_v33  ;;  %v2928_v19 = vpop.eup %2927  ;;  %v4180_v32 = vmul.f32 %v4150_v15, %v3975_v35  ;;  %v4184_v61 = vmul.f32 %v4150_v15, %v4017_v17 }
 0x448   : > { %4812 = vst [vmem:[#allocation13_spill] sm:$0xff] %v4154_v53  ;;  %v4188_v57 = vmul.f32 %v4150_v15, %v4031_v54  ;;  %v4192_v25 = vmul.f32 %v4150_v15, %v4067_v14  ;;  %v4195_v33 = vmul.f32 %v2926_v62, %v4026_v37  ;;  %v2214_v42 = vadd.f32 %v2213_v46, %v4160_v2  ;;  %v2930_v56 = vpop.eup %2929  ;;  %v4816_v54 = vld [vmem:[#allocation33_spill] sm:$0xff]  ;;  %v4820_v53 = vld [vmem:[#allocation15_spill] sm:$0xff] }
 0x449   : > { %v2932_v35 = vpop.eup %2931  ;;  %v4199_v49 = vmul.f32 %v2928_v19, %v4040_v41  ;;  %v4204_v28 = vmul.f32 0.0, %v2930_v56  ;;  %v4209_v37 = vmul.f32 %v4150_v15, %v3881_v39  ;;  %v4213_v34 = vmul.f32 %v4150_v15, %v3895_v12 }
 0x44a   : > { %4813 = vst [vmem:[#allocation14_spill] sm:$0xff] %v4192_v25  ;;  %v2215_v17 = vadd.f32 %v2214_v42, %v4195_v33  ;;  %v4215_v63 = vmul.f32 0.0, %v2932_v35  ;;  %v4221_v21 = vmul.f32 %v4150_v15, %v3936_v18  ;;  %v4225_v13 = vmul.f32 %v4150_v15, %v3950_v29  ;;  %v4817_v25 = vld [vmem:[#allocation8_spill] sm:$0xff] }
 0x44b   : > { %v4234_v46 = vmul.f32 %v4150_v15, %v3986_v43  ;;  %v4240_v62 = vmul.f32 %v4150_v15, %v4003_v47  ;;  %v4246_v19 = vmul.f32 %v4150_v15, %v4046_v27  ;;  %v4251_v43 = vmul.f32 %v4150_v15, %v4057_v5  ;;  %v4814_v5 = vld [vmem:[#allocation9_spill] sm:$0xff] }
 0x44c   : > { %v2216_v14 = vadd.f32 %v2215_v17, %v4199_v49  ;;  %v2231_v41 = vmul.f32 %v4150_v15, %v4814_v5  ;;  %v2233_v56 = vmul.f32 %v4150_v15, %v4815_v9  ;;  %v2227_v47 = vmul.f32 %v4150_v15, %v4816_v54  ;;  %v4819_v5 = vld [vmem:[#allocation11_spill] sm:$0xff] }
 0x44d   : > { %v2229_v17 = vmul.f32 %v4150_v15, %v4817_v25 }
 0x44e   : > { %v2217_v39 = vadd.f32 %v2216_v14, %v4204_v28 }
 0x44f   : > { %v2291_v9 = vpack.c.bf16 %v2229_v17, %v2227_v47 }
 0x450   : > { %v2218_v42 = vadd.f32 %v2217_v39, %v4215_v63 }
 0x452   : > { %v2219_v35 = vrot.slane %v2218_v42, 4 }
 0x454   : > { %v2220_v14 = vadd.f32 %v2219_v35, %v2218_v42 }
 0x456   : > { %v2221_v29 = vrot.slane %v2220_v14, 2 }
 0x458   : > { %v2222_v27 = vadd.f32 %v2221_v29, %v2220_v14  ;;  %v4818_v14 = vld [vmem:[#allocation16_spill] sm:$0xff] }
 0x45a   : > { %v2223_v12 = vrot.slane %v2222_v27, 1 }
 0x45c   : > { %v2224_v18 = vadd.f32 %v2223_v12, %v2222_v27 }
 0x45e   : > { %2933 = vrcp.f32 %v2224_v18 }
 0x468   : > { %v4259_v39 = vpop.eup %2933 }
 0x469   : > { %v2228_v29 = vmul.f32 %v4259_v39, %v3905_v0  ;;  %v2230_v12 = vmul.f32 %v4259_v39, %v3908_v6  ;;  %v2232_v18 = vmul.f32 %v4259_v39, %v3919_v48  ;;  %v2234_v42 = vmul.f32 %v4259_v39, %v3932_v30 }
 0x46a   : > { %v2236_v54 = vmul.f32 %v4259_v39, %v3946_v45  ;;  %v2238_v25 = vmul.f32 %v4259_v39, %v3960_v16  ;;  %v2239_v0 = vmul.f32 %v4150_v15, %v4818_v14  ;;  %v2293_v6 = vpack.c.bf16 %v2233_v56, %v2231_v41 }
 0x46b   : > { %v2292_v35 = vpack.c.bf16 %v2230_v12, %v2228_v29  ;;  %v2294_v27 = vpack.c.bf16 %v2234_v42, %v2232_v18  ;;  %v2235_v48 = vmul.f32 %v4150_v15, %v4819_v5  ;;  %v2237_v30 = vmul.f32 %v4150_v15, %v4820_v53  ;;  %v4821_v42 = vld [vmem:[#allocation18_spill] sm:$0xff] }
 0x46c   : > { %v2240_v47 = vmul.f32 %v4259_v39, %v3972_v20  ;;  %v4291_v45 = vmul.f32 %v4259_v39, %v4090_v59  ;;  %v4295_v16 = vmul.f32 %v4259_v39, %v4097_v38  ;;  %v2242_v41 = vmul.f32 %v4259_v39, %v3982_v58 }
 0x46d   : > { %2335 = vmatprep.subr.bf16.mxu0 %v2292_v35  ;;  %v4301_v56 = vmul.f32 %v4259_v39, %v4103_v44  ;;  %v4305_v53 = vmul.f32 %v4259_v39, %v4106_v26  ;;  %v4309_v20 = vmul.f32 %v4259_v39, %v4113_v4  ;;  %v2296_v59 = vpack.c.bf16 %v2238_v25, %v2236_v54 }
 0x46e   : > { %2336 = vmatpush1.bf16.msra.mxu0 %v2291_v9  ;;  %v2308_v38 = vpack.c.bf16 %v4295_v16, %v4291_v45  ;;  %v4315_v17 = vmul.f32 %v4259_v39, %v4117_v3  ;;  %v4319_v58 = vmul.f32 %v4259_v39, %v4123_v51  ;;  %v4325_v26 = vmul.f32 %v4259_v39, %v4129_v1 }
 0x46f   : > { %2337 = vmatprep.subr.bf16.mxu0 %v2294_v27  ;;  %v2310_v44 = vpack.c.bf16 %v4305_v53, %v4301_v56  ;;  %v4329_v4 = vmul.f32 %v4259_v39, %v4139_v52  ;;  %v4333_v29 = vmul.f32 %v4259_v39, %v4143_v40  ;;  %v4339_v51 = vmul.f32 %v4259_v39, %v4146_v36  ;;  %v4824_v53 = vld [vmem:[#allocation26_spill] sm:$0xff] }
 0x470   : > { %v2312_v3 = vpack.c.bf16 %v4315_v17, %v4309_v20  ;;  %v4343_v1 = vmul.f32 %v4259_v39, %v4160_v2  ;;  %v4347_v52 = vmul.f32 %v4259_v39, %v4195_v33  ;;  %v2314_v40 = vpack.c.bf16 %v4325_v26, %v4319_v58  ;;  %v4825_v20 = vld [vmem:[#allocation28_spill] sm:$0xff]  ;;  %v4827_v58 = vld [vmem:[#allocation34_spill] sm:$0xff] }
 0x471   : > { %v2316_v12 = vpack.c.bf16 %v4333_v29, %v4329_v4  ;;  %v2286_v18 = vmul.f32 %v4259_v39, %v4199_v49  ;;  %v2288_v36 = vmul.f32 %v4259_v39, %v4204_v28  ;;  %v2241_v2 = vmul.f32 %v4150_v15, %v4821_v42  ;;  %v4828_v4 = vld [vmem:[#allocation12_spill] sm:$0xff] }
 0x472   : > { %2338 = vmatpush1.bf16.msra.mxu0 %v2293_v6  ;;  %v2295_v35 = vpack.c.bf16 %v2237_v30, %v2235_v48  ;;  %v2318_v33 = vpack.c.bf16 %v4343_v1, %v4339_v51  ;;  %v2290_v9 = vmul.f32 %v4259_v39, %v4215_v63  ;;  %v2298_v54 = vpack.c.bf16 %v2242_v41, %v2240_v47  ;;  %v4822_v6 = vld [vmem:[#allocation25_spill] sm:$0xff]  ;;  %v4823_v47 = vld [vmem:[#allocation27_spill] sm:$0xff] }
 0x473   : > { %2339 = vmatprep.subr.bf16.mxu0 %v2296_v59  ;;  %v2244_v25 = vmul.f32 %v4259_v39, %v3999_v55  ;;  %v2246_v49 = vmul.f32 %v4259_v39, %v4014_v24  ;;  %v2320_v14 = vpack.c.bf16 %v2286_v18, %v4347_v52  ;;  %v2297_v27 = vpack.c.bf16 %v2241_v2, %v2239_v0  ;;  %v4829_v51 = vld [vmem:[#allocation31_spill] sm:$0xff] }
 0x474   : > { %v2322_v28 = vpack.c.bf16 %v2290_v9, %v2288_v36  ;;  %v2243_v5 = vmul.f32 %v4150_v15, %v4822_v6  ;;  %v2245_v48 = vmul.f32 %v4150_v15, %v3774_v22  ;;  %v2248_v30 = vmul.f32 %v4259_v39, %v4028_v11  ;;  %v2961_v6 = vld [vmem:[%s3244_s12 + $0x10] sm:$0xff] }
 0x475   : > { %v2300_v63 = vpack.c.bf16 %v2246_v49, %v2244_v25  ;;  %v2250_v55 = vmul.f32 %v4259_v39, %v4042_v31  ;;  %v2247_v24 = vmul.f32 %v4150_v15, %v3785_v10  ;;  %v2249_v0 = vmul.f32 %v4150_v15, %v4823_v47  ;;  %v4826_v31 = vld [vmem:[#allocation29_spill] sm:$0xff]  ;;  %v4460_v47 = vld [vmem:[%s3224_s25 + $0x10] sm:$0xff] }
 0x476   : > { %2340 = vmatpush1.bf16.msra.mxu0 %v2295_v35  ;;  %v2299_v41 = vpack.c.bf16 %v2245_v48, %v2243_v5  ;;  %v2252_v22 = vmul.f32 %v4259_v39, %v4824_v53  ;;  %v2254_v59 = vmul.f32 %v4259_v39, %v4825_v20  ;;  %v2251_v17 = vmul.f32 %v4150_v15, %v4826_v31  ;;  %v4449_v48 = vld [vmem:[%s3224_s25] sm:$0xff]  ;;  %v2415_v31 = vld [vmem:[%s4588_s6 + $0x8] sm:$0xff] }
 0x477   : > { %2341 = vmatprep.subr.bf16.mxu0 %v2298_v54  ;;  %v2302_v56 = vpack.c.bf16 %v2250_v55, %v2248_v30  ;;  %v2301_v11 = vpack.c.bf16 %v2249_v0, %v2247_v24  ;;  %v2253_v10 = vmul.f32 %v4150_v15, %v4827_v58  ;;  %v2256_v29 = vmul.f32 %v4259_v39, %v4828_v4  ;;  %v2962_v30 = vld [vmem:[%s3244_s12 + $0x18] sm:$0xff] }
 0x478   : > { %v2304_v26 = vpack.c.bf16 %v2254_v59, %v2252_v22  ;;  %v2258_v1 = vmul.f32 %v4259_v39, %v4829_v51  ;;  %v4830_v15 = vpack.c.bf16 %v4164_v50, %v4158_v7  ;;  %v4831_v39 = vpack.c.bf16 %v4213_v34, %v4209_v37  ;;  %v4838_v34 = vld [vmem:[#allocation13_spill] sm:$0xff]  ;;  %v4463_v0 = vld [vmem:[%s3224_s25 + $0x18] sm:$0xff]  ;;  %v2416_v51 = vld [vmem:[%s4588_s6 + $0x10] sm:$0xff] }
 0x479   : > { %v2303_v52 = vpack.c.bf16 %v2253_v10, %v2251_v17  ;;  %v4832_v25 = vpack.c.bf16 %v4172_v23, %v4168_v60  ;;  %v4833_v7 = vpack.c.bf16 %v4225_v13, %v4221_v21  ;;  %v4834_v50 = vpack.c.bf16 %v4180_v32, %v4176_v8  ;;  %v4839_v21 = vld [vmem:[#allocation14_spill] sm:$0xff]  ;;  %v2414_v17 = vld [vmem:[%s4588_s6] sm:$0xff] }
 0x47a   : > { %2342 = vmatpush1.bf16.msra.mxu0 %v2297_v27  ;;  %v2306_v18 = vpack.c.bf16 %v2258_v1, %v2256_v29  ;;  %v4835_v37 = vpack.c.bf16 %v4240_v62, %v4234_v46  ;;  %v4836_v60 = vpack.c.bf16 %v4188_v57, %v4184_v61  ;;  %v4837_v23 = vpack.c.bf16 %v4251_v43, %v4246_v19  ;;  %v4427_v32 = vld [vmem:[%s363_s23 + $0x10] sm:$0xff]  ;;  %v4429_v61 = vld [vmem:[%s363_s23 + $0x18] sm:$0xff]  ;;  %v4431_v57 = vld [vmem:[%s363_s23] sm:$0xff]  ;;  %v2328_v19 = vpop.permute.xlu1 %2327 }
 0x47b   : > { %2343 = vmatprep.subr.bf16.mxu0 %v2300_v63  ;;  %v4840_v8 = vpack.c.bf16 %v4838_v34, %v4839_v21  ;;  %v2393_v13 = vadd.f32 %v4429_v61, %v4427_v32  ;;  %v4435_v46 = vld [vmem:[%s363_s23 + $0x8] sm:$0xff]  ;;  %v2409_v53 = vadd.f32 %v4463_v0, %v4460_v47 }
 0x47c   : > { %v2390_v62 = vadd.f32 %v4435_v46, %v4431_v57  ;;  %v4452_v63 = vld [vmem:[%s3224_s25 + $0x8] sm:$0xff]  ;;  %s353_s25 = scalar_lea.vmem [#allocation5], %s2722_s24 }
 0x47d   : > { %2394 = vadd.xlane.f32.xlu0 %v2393_v13 }
 0x47e   : > { %2344 = vmatpush1.bf16.msra.mxu0 %v2299_v41  ;;  %2391 = vadd.xlane.f32.xlu1 %v2390_v62 }
 0x47f   : > { %2345 = vmatprep.subr.bf16.mxu0 %v2302_v56  ;;  %v2406_v56 = vadd.f32 %v4452_v63, %v4449_v48 }
 0x482   : > { %2346 = vmatpush1.bf16.msra.mxu0 %v2301_v11 }
 0x483   : > { %2347 = vmatprep.subr.bf16.mxu0 %v2304_v26 }
 0x486   : > { %2348 = vmatpush1.bf16.msra.mxu0 %v2303_v52 }
 0x487   : > { %2349 = vmatprep.subr.bf16.mxu0 %v2306_v18 }
 0x48a   : > { %2350 = vmatpush1.bf16.msra.mxu0 %v4830_v15 }
 0x48b   : > { %v570_v36 = vpop.f32.mrb[8].mxu0  ;;  %2351 = vmatprep.subr.bf16.mxu0 %v2308_v38  ;;  %v2333_v38 = vpop.permute.xlu0 %2332 }
 0x48c   : > { %v572_v42 = vpop.f32.mrb[9].mxu0 }
 0x48d   : > { %v574_v2 = vpop.f32.mrb[10].mxu0 }
 0x48e   : > { %v2323_v35 = vpack.c.bf16 %v574_v2, %v570_v36  ;;  %v576_v9 = vpop.f32.mrb[11].mxu0  ;;  %2352 = vmatpush1.bf16.msra.mxu0 %v4831_v39  ;;  %v2417_v36 = vld [vmem:[%s4588_s6 + $0x18] sm:$0xff] }
 0x48f   : > { %v2324_v54 = vpack.c.bf16 %v576_v9, %v572_v42  ;;  %2353 = vmatprep.subr.bf16.mxu0 %v2310_v44  ;;  %v2418_v9 = vld [vmem:[%s4588_s6 + $0x20] sm:$0xff] }
 0x491   : > { %2367 = vmatprep.mubr.bf16.mxu0 %v2324_v54 }
 0x492   : > { %2354 = vmatpush1.bf16.msra.mxu0 %v4832_v25 }
 0x493   : > { %2355 = vmatprep.subr.bf16.mxu0 %v2312_v3 }
 0x496   : > { %2356 = vmatpush1.bf16.msra.mxu0 %v4833_v7  ;;  %v2419_v7 = vld [vmem:[%s4588_s6 + $0x28] sm:$0xff] }
 0x497   : > { %2357 = vmatprep.subr.bf16.mxu0 %v2314_v40  ;;  %v2959_v40 = vld [vmem:[%s3244_s12] sm:$0xff] }
 0x49a   : > { %2358 = vmatpush1.bf16.msra.mxu0 %v4834_v50 }
 0x49b   : > { %2359 = vmatprep.subr.bf16.mxu0 %v2316_v12 }
 0x49e   : > { %2360 = vmatpush1.bf16.msra.mxu0 %v4835_v37 }
 0x49f   : > { %2361 = vmatprep.subr.bf16.mxu0 %v2318_v33 }
 0x4a2   : > { %2362 = vmatpush1.bf16.msra.mxu0 %v4836_v60 }
 0x4a3   : > { %2363 = vmatprep.subr.bf16.mxu0 %v2320_v14  ;;  %v2960_v14 = vld [vmem:[%s3244_s12 + $0x8] sm:$0xff]  ;;  %s2561_s12 = sshll.u32 %s353_s25, 4  ;;  %s4538_s12 = int_to_ptr.vmem [resolvable:$true] %s2561_s12 }
 0x4a4   : > { %s2993_s10 = scalar_lea.vmem %s4538_s12, 1536  ;;  %p3000_p10 = scmp.lt.s32.totalorder %s4538_s12, %s2998_s13 }
 0x4a5   : > { %p2994_p6 = scmp.ne.s32.totalorder %s4538_s12, %s2993_s10  ;;  %p3001_p0 = scmp.lt.s32.totalorder %s2999_s21, %s2993_s10 }
 0x4a6   : > { %2364 = vmatpush1.bf16.msra.mxu0 %v4837_v23 }
 0x4a7   : > { %2365 = vmatprep.subr.bf16.mxu0 %v2322_v28  ;;  %p2995_p13 = pnand %p2994_p6, %p4841_p12  ;;  %p3002_p2 = por %p3001_p0, %p3000_p10 }
 0x4a9   : > { %p2996_p8 = pneg %p2995_p13 }
 0x4aa   : > { %2366 = vmatpush1.bf16.msra.mxu0 %v4840_v8 }
 0x4ab   : > { %p3003_p4 = pnand %p3002_p2, %p2996_p8 }
 0x4ad   : > { %2368 = vmatmul.mubr.bf16.vlgmr.msra.gmra.mrb[12].mxu0 %v2323_v35 }
 0x50a   : > { %v2395_v22 = vpop.xlane.xlu0 %2394 }
 0x50b   : > { %v2392_v20 = vpop.xlane.xlu1 %2391  ;;  %v2397_v59 = vmul.f32 0.00390625, %v2395_v22 }
 0x50c   : > { %v2396_v11 = vmul.f32 0.00390625, %v2392_v20  ;;  %v2458_v20 = vld [vmem:[%s4589_s7 + $0x8] sm:$0xff] }
 0x50d   : > { %v2421_v58 = vmul.f32 %v2415_v31, %v2397_v59  ;;  %v2457_v59 = vld [vmem:[%s4589_s7] sm:$0xff]  ;;  %v2460_v31 = vld [vmem:[%s4589_s7 + $0x18] sm:$0xff] }
 0x50e   : > { %v2420_v10 = vmul.f32 %v2414_v17, %v2396_v11  ;;  %v2459_v17 = vld [vmem:[%s4589_s7 + $0x10] sm:$0xff] }
 0x50f   : > { %v2424_v26 = vsel %vm2422_vm5, %v2421_v58, 0.0 }
 0x510   : > { %v2423_v4 = vsel %vm2422_vm5, %v2420_v10, 0.0 }
 0x511   : > { %v2425_v29 = vadd.f32 %v2424_v26, %v2423_v4 }
 0x513   : > { %v2426_v18 = vrot.slane %v2425_v29, 4 }
 0x515   : > { %v2427_v25 = vadd.f32 %v2426_v18, %v2425_v29 }
 0x517   : > { %v2428_v62 = vrot.slane %v2427_v25, 2 }
 0x580   : > { %v2369_v43 = vpop.f32.mrb[12].mxu0 }
 0x581   : > { %v2370_v45 = vadd.f32 %v2369_v43, %v2328_v19  ;;  %v2371_v16 = vpop.f32.mrb[13].mxu0 }
 0x582   : > { %v2372_v44 = vadd.f32 %v2371_v16, %v2328_v19  ;;  %v2373_v3 = vpop.f32.mrb[14].mxu0 }
 0x583   : > { %v4440_v12 = vadd.f32 %v2959_v40, %v2370_v45  ;;  %v2374_v33 = vadd.f32 %v2373_v3, %v2333_v38  ;;  %v2375_v49 = vpop.f32.mrb[15].mxu0 }
 0x584   : > { %v4443_v28 = vadd.f32 %v2960_v14, %v2372_v44  ;;  %v2376_v27 = vadd.f32 %v2375_v49, %v2333_v38  ;;  %v2429_v38 = vadd.f32 %v2428_v62, %v2427_v25 }
 0x585   : > { %v4446_v5 = vadd.f32 %v2961_v6, %v2374_v33 }
 0x586   : > { %v4455_v55 = vadd.f32 %v2962_v30, %v2376_v27  ;;  %v2398_v24 = vadd.f32 %v4443_v28, %v4440_v12  ;;  %v2430_v49 = vrot.slane %v2429_v38, 1 }
 0x588   : > { %2399 = vadd.xlane.f32.xlu0 %v2398_v24  ;;  %v2401_v41 = vadd.f32 %v4455_v55, %v4446_v5  ;;  %v2431_v24 = vadd.f32 %v2430_v49, %v2429_v38 }
 0x58a   : > { %2402 = vadd.xlane.f32.xlu1 %v2401_v41 }
 0x58c   : > { %2407 = vadd.xlane.f32.xlu0 %v2406_v56 }
 0x58e   : > { %2410 = vadd.xlane.f32.xlu1 %v2409_v53 }
 0x615   : > { %v2400_v1 = vpop.xlane.xlu0 %2399 }
 0x616   : > { %v2404_v52 = vmul.f32 0.00390625, %v2400_v1  ;;  %v2462_v1 = vld [vmem:[%s4589_s7 + $0x28] sm:$0xff] }
 0x617   : > { %v2403_v42 = vpop.xlane.xlu1 %2402 }
 0x618   : > { %v2432_v2 = vmul.f32 %v2416_v51, %v2404_v52  ;;  %v2405_v35 = vmul.f32 0.00390625, %v2403_v42  ;;  %v2461_v52 = vld [vmem:[%s4589_s7 + $0x20] sm:$0xff] }
 0x619   : > { %v2408_v15 = vpop.xlane.xlu0 %2407 }
 0x61a   : > { %v2433_v54 = vmul.f32 %v2417_v36, %v2405_v35  ;;  %v2412_v39 = vmul.f32 0.00390625, %v2408_v15  ;;  %v2434_v37 = vsel %vm2422_vm5, %v2432_v2, 0.0 }
 0x61b   : > { %v2411_v50 = vpop.xlane.xlu1 %2410 }
 0x61c   : > { %v2435_v60 = vsel %vm2422_vm5, %v2433_v54, 0.0  ;;  %v2413_v23 = vmul.f32 0.00390625, %v2411_v50  ;;  %v2444_v34 = vmul.f32 %v2418_v9, %v2412_v39 }
 0x61d   : > { %v2436_v21 = vadd.f32 %v2435_v60, %v2434_v37 }
 0x61e   : > { %v2445_v8 = vmul.f32 %v2419_v7, %v2413_v23  ;;  %v2446_v13 = vsel %vm2422_vm5, %v2444_v34, 0.0 }
 0x61f   : > { %v2437_v19 = vrot.slane %v2436_v21, 4 }
 0x620   : > { %v2447_v43 = vsel %vm2422_vm5, %v2445_v8, 0.0 }
 0x621   : > { %v2438_v45 = vadd.f32 %v2437_v19, %v2436_v21  ;;  %v2448_v16 = vadd.f32 %v2447_v43, %v2446_v13 }
 0x623   : > { %v2439_v44 = vrot.slane %v2438_v45, 2  ;;  %v2449_v3 = vrot.slane %v2448_v16, 4 }
 0x625   : > { %v2440_v40 = vadd.f32 %v2439_v44, %v2438_v45  ;;  %v2450_v33 = vadd.f32 %v2449_v3, %v2448_v16 }
 0x627   : > { %v2441_v14 = vrot.slane %v2440_v40, 1  ;;  %v2451_v27 = vrot.slane %v2450_v33, 2 }
 0x629   : > { %v2442_v6 = vadd.f32 %v2441_v14, %v2440_v40  ;;  %v2452_v30 = vadd.f32 %v2451_v27, %v2450_v33 }
 0x62b   : > { %v2453_v41 = vrot.slane %v2452_v30, 1  ;;  %v2443_v56 = vadd.f32 %v2442_v6, %v2431_v24 }
 0x62d   : > { %v2454_v53 = vadd.f32 %v2453_v41, %v2452_v30 }
 0x62f   : > { %v2455_v22 = vadd.f32 %v2454_v53, %v2443_v56 }
 0x631   : > { %v2456_v11 = vmax.f32 %v2455_v22, 0.0 }
 0x633   : > { %v2464_v58 = vmul.f32 %v2458_v20, %v2456_v11  ;;  %v2463_v10 = vmul.f32 %v2457_v59, %v2456_v11  ;;  %v2466_v29 = vmul.f32 %v2460_v31, %v2456_v11  ;;  %v2465_v51 = vmul.f32 %v2459_v17, %v2456_v11 }
 0x634   : > { %v2468_v42 = vmul.f32 %v2462_v1, %v2456_v11  ;;  %v2467_v2 = vmul.f32 %v2461_v52, %v2456_v11 }
 0x635   : > { %v2472_v26 = vsel %vm2422_vm5, %v2464_v58, 0.0  ;;  %v2469_v4 = vsel %vm2422_vm5, %v2463_v10, 0.0  ;;  %v2478_v18 = vsel %vm2422_vm5, %v2466_v29, 0.0  ;;  %v2475_v36 = vsel %vm2422_vm5, %v2465_v51, 0.0 }
 0x636   : > { %2473 = vadd.xlane.f32.xlu1 %v2472_v26  ;;  %2470 = vadd.xlane.f32.xlu0 %v2469_v4  ;;  %v2484_v35 = vsel %vm2422_vm5, %v2468_v42, 0.0  ;;  %v2481_v9 = vsel %vm2422_vm5, %v2467_v2, 0.0 }
 0x63a   : > { %2479 = vadd.xlane.f32.xlu1 %v2478_v18  ;;  %2476 = vadd.xlane.f32.xlu0 %v2475_v36 }
 0x63e   : > { %2485 = vadd.xlane.f32.xlu1 %v2484_v35  ;;  %2482 = vadd.xlane.f32.xlu0 %v2481_v9 }
 0x6c3   : > { %v2474_v15 = vpop.xlane.xlu1 %2473  ;;  %v2471_v54 = vpop.xlane.xlu0 %2470 }
 0x6c4   : > { %v2711_v39 = vmul.f32 -1.442695, %v2474_v15  ;;  %v2710_v25 = vmul.f32 -1.442695, %v2471_v54 }
 0x6c6   : > { %2935 = vpow2.f32 %v2711_v39 }
 0x6c7   : > { %2937 = vpow2.f32 %v2710_v25  ;;  %v2480_v7 = vpop.xlane.xlu1 %2479  ;;  %v2477_v50 = vpop.xlane.xlu0 %2476 }
 0x6c8   : > { %v2713_v37 = vmul.f32 -1.442695, %v2480_v7  ;;  %v2712_v60 = vmul.f32 -1.442695, %v2477_v50 }
 0x6ca   : > { %2939 = vpow2.f32 %v2713_v37 }
 0x6cb   : > { %2941 = vpow2.f32 %v2712_v60  ;;  %v2486_v23 = vpop.xlane.xlu1 %2485  ;;  %v2483_v34 = vpop.xlane.xlu0 %2482 }
 0x6cc   : > { %v2715_v21 = vmul.f32 -1.442695, %v2486_v23  ;;  %v2714_v8 = vmul.f32 -1.442695, %v2483_v34 }
 0x6ce   : > { %2943 = vpow2.f32 %v2715_v21 }
 0x6cf   : > { %2945 = vpow2.f32 %v2714_v8 }
 0x6d0   : > { %v2936_v13 = vpop.eup %2935 }
 0x6d1   : > { %v2938_v62 = vpop.eup %2937  ;;  %v2506_v19 = vadd.f32 1.0, %v2936_v13 }
 0x6d2   : > { %v2505_v43 = vadd.f32 1.0, %v2938_v62 }
 0x6d3   : > { %2947 = vrcp.f32 %v2506_v19 }
 0x6d4   : > { %v2940_v45 = vpop.eup %2939  ;;  %2949 = vrcp.f32 %v2505_v43 }
 0x6d5   : > { %v2942_v16 = vpop.eup %2941  ;;  %v2508_v38 = vadd.f32 1.0, %v2940_v45 }
 0x6d6   : > { %v2507_v44 = vadd.f32 1.0, %v2942_v16 }
 0x6d7   : > { %2951 = vrcp.f32 %v2508_v38 }
 0x6d8   : > { %v2944_v3 = vpop.eup %2943  ;;  %2953 = vrcp.f32 %v2507_v44 }
 0x6d9   : > { %v2946_v40 = vpop.eup %2945  ;;  %v2510_v33 = vadd.f32 1.0, %v2944_v3 }
 0x6da   : > { %v2509_v49 = vadd.f32 1.0, %v2946_v40 }
 0x6db   : > { %2955 = vrcp.f32 %v2510_v33 }
 0x6dc   : > { %2957 = vrcp.f32 %v2509_v49 }
 0x6dd   : > { %v2948_v14 = vpop.eup %2947 }
 0x6de   : > { %v2950_v27 = vpop.eup %2949  ;;  %v2525_v6 = vmul.f32 %v2948_v14, %v4427_v32  ;;  %v2526_v30 = vmul.f32 %v2948_v14, %v4429_v61 }
 0x6df   : > { %v2523_v24 = vmul.f32 %v2950_v27, %v4431_v57  ;;  %v2524_v41 = vmul.f32 %v2950_v27, %v4435_v46 }
 0x6e0   : > { %2529 = vst [vmem:[%s353_s25 + $0x10] sm:$0xff] %v2525_v6  ;;  %2530 = vst [vmem:[%s353_s25 + $0x18] sm:$0xff] %v2526_v30 }
 0x6e1   : > { %v2952_v56 = vpop.eup %2951  ;;  %2527 = vst [vmem:[%s353_s25] sm:$0xff] %v2523_v24  ;;  %2528 = vst [vmem:[%s353_s25 + $0x8] sm:$0xff] %v2524_v41 }
 0x6e2   : > { %v2954_v53 = vpop.eup %2953  ;;  %v2533_v22 = vmul.f32 %v2952_v56, %v4446_v5  ;;  %v2534_v20 = vmul.f32 %v2952_v56, %v4455_v55 }
 0x6e3   : > { %v2531_v32 = vmul.f32 %v2954_v53, %v4440_v12  ;;  %v2532_v61 = vmul.f32 %v2954_v53, %v4443_v28 }
 0x6e4   : > { %2537 = vst [vmem:[%s353_s25 + $0x30] sm:$0xff] %v2533_v22  ;;  %2538 = vst [vmem:[%s353_s25 + $0x38] sm:$0xff] %v2534_v20 }
 0x6e5   : > { %v2956_v57 = vpop.eup %2955  ;;  %2535 = vst [vmem:[%s353_s25 + $0x20] sm:$0xff] %v2531_v32  ;;  %2536 = vst [vmem:[%s353_s25 + $0x28] sm:$0xff] %v2532_v61 }
 0x6e6   : > { %v2958_v46 = vpop.eup %2957  ;;  %v2541_v59 = vmul.f32 %v2956_v57, %v4460_v47  ;;  %v2542_v5 = vmul.f32 %v2956_v57, %v4463_v0 }
 0x6e7   : > { %v2539_v12 = vmul.f32 %v2958_v46, %v4449_v48  ;;  %v2540_v28 = vmul.f32 %v2958_v46, %v4452_v63 }
 0x6e8   : > { %2545 = vst [vmem:[%s353_s25 + $0x50] sm:$0xff] %v2541_v59  ;;  %2546 = vst [vmem:[%s353_s25 + $0x58] sm:$0xff] %v2542_v5 }
 0x6e9   : > { %2543 = vst [vmem:[%s353_s25 + $0x40] sm:$0xff] %v2539_v12  ;;  %2544 = vst [vmem:[%s353_s25 + $0x48] sm:$0xff] %v2540_v28 }
 0x6ea   : > { %3006 = shalt.err (!%p3003_p4)
}
 0x6eb   : > { %s3007_s23 = scalar_lea.hbm %s4534_s9, 1536  ;;  %s3011_s26 = scalar_lea.hbm %s4590_s8, 3072 }
 0x6ec   : > { %p3008_p5 = scmp.ne.s32.totalorder %s4534_s9, %s3007_s23  ;;  %p3012_p1 = scmp.lt.u32.totalorder %s4534_s9, %s4590_s8 }
 0x6ed   : > { %p3013_p3 = scmp.lt.u32.totalorder %s3011_s26, %s3007_s23  ;;  %p3015_p6 = scmp.lt.u32.totalorder %s3007_s23, %s4534_s9 }
 0x6ee   : > { %p3009_p7 = pnand %p3008_p5, %p4841_p12 }
 0x6ef   : > { %p3014_p11 = por %p3013_p3, %p3012_p1 }
 0x6f0   : > { %p3010_p9 = pneg %p3009_p7 }
 0x6f1   : > { %p3016_p13 = por %p3015_p6, %p3014_p11 }
 0x6f3   : > { %p3017_p8 = pnand %p3016_p13, %p3010_p9 }
 0x6f5   : > { %3020 = shalt.err (!%p3017_p8)
}
 0x6f6   : > { %s3069_s10 = smov 256   ;;  %s3070_s15 = smov 16  }
 0x6f7   : > { %2726 = dma.vmem_to_hbm [thread:$0]  (%p4841_p12), %s4538_s12, 1536, %s4534_s9, %s2548_s20, %s3069_s10, %s3069_s10, %s3070_s15  }
 0x6f8 PF: > { %s2576_s13 = sand.u32 1, %s3047_s27   ;;  %p4842_p10 = scmp.ne.s32.totalorder %s4661_s18, 0 }
 0x6f9   : > { %p4843_p0 = scmp.ge.s32.totalorder %s3059_s30, 2  ;;  %s2577_s21 = scalar_lea.sflag [#allocation4], %s2576_s13 }
 0x6fb   : > { %p2733_p2 = pnand %p4843_p0, %p4842_p10 }
 0x6fd   : > { %3042 = dma.done.wait (!%p2733_p2), %s2577_s21, 1536  }
 0x6fe   : > { %3044 = vsyncadd (!%p2733_p2), %s2577_s21, 4294965760  ;;  %p21_p4 = scmp.ge.s32.totalorder %s3141_s11, 4   ;;  %s4844_s27 = smov %s3051_s28 }
 0x6ff   : > { %s4845_s28 = smov %s3055_s29  ;;  %s4846_s29 = smov %s3153_s14 }
 0x700   : > { %s4847_s30 = smov %s3141_s11  ;;  %23 = sbr.rel (!%p21_p4) target bundleno = 5 (0x5), region = 103 }
 0x707   :  { %2582 = vsyncpa [#allocation3], 1 }
 0x708   :  { %2584 = vsyncpa [#allocation3 + $0x1], 1 }
 0x709   :  { %2585 = vsyncpa [#allocation4], 1 }
 0x70a   :  { %2587 = vsyncpa [#allocation4 + $0x1], 1 }

</bundles_post_ra>
